<compile_context>
chip_gen: v5e
topology: v5e:2x2
jax: 0.10.0
libtpu: 0.0.40
codegen_flags: <defaults>
</compile_context>

<pallas_src>
import functools
from math import sqrt

import numpy as np
import jax
import jax.numpy as jnp
from jax import lax
from jax.experimental import pallas as pl
from jax.experimental.pallas import tpu as pltpu


# ----------------------------------------------------------------------------
# In-kernel helpers (operate on loaded arrays, only used inside the Pallas kernel)
# ----------------------------------------------------------------------------

def _cln_core(x, scale, shift, gamma, beta):
    """Conditional LayerNorm in f32: LN over last dim, then * (1 + clamp(scale)) + shift."""
    mean = jnp.mean(x, axis=-1, keepdims=True)
    var = jnp.mean((x - mean) ** 2, axis=-1, keepdims=True)
    normed = (x - mean) * lax.rsqrt(var + 1e-5)
    normed = normed * gamma + beta
    scale = jnp.clip(scale, -0.9, 10.0)
    return normed * (1.0 + scale) + shift


def _erf_poly(x):
    """erf via Abramowitz & Stegun 7.1.26 (|err| <= 1.5e-7); exp + approx reciprocal."""
    a1, a2, a3, a4, a5 = 0.254829592, -0.284496736, 1.421413741, -1.453152027, 1.061405429
    p = 0.3275911
    sgn = jnp.where(x >= 0.0, 1.0, -1.0)
    ax = jnp.abs(x)
    t = pl.reciprocal(1.0 + p * ax, approx=True)          # EUP slot, not VALU divide
    poly = ((((a5 * t + a4) * t + a3) * t + a2) * t + a1) * t
    return sgn * (1.0 - poly * jnp.exp(-ax * ax))


def _gelu_erf(h):
    return 0.5 * h * (1.0 + _erf_poly(h * 0.7071067811865476))


def _mha_core(q_src, kv_src, wq, wkv, wo, bq, bkv, bo, *, num_heads, cdt):
    """torch nn.MultiheadAttention semantics for one batch element.

    q_src: (Nq, D) f32, kv_src: (Nk, D) f32.
    wq is pre-scaled by 1/sqrt(head_dim); wkv = [wk | wv] (D, 2D).
    MXU operands in `cdt` (bf16 on the fast path), accumulation/softmax in f32.
    No kh.T (dot_general contracting last dims) and no lane-dim concat
    (per-head output-projection accumulation).
    """
    nq, d = q_src.shape
    hd = d // num_heads

    qc = q_src.astype(cdt)
    kvc = kv_src.astype(cdt)

    q = jnp.dot(qc, wq, preferred_element_type=jnp.float32) + bq      # (Nq, D), pre-scaled
    kv = jnp.dot(kvc, wkv, preferred_element_type=jnp.float32) + bkv  # (Nk, 2D) = [K | V]

    acc = jnp.zeros((nq, d), jnp.float32)
    for h in range(num_heads):                       # static unroll over heads
        sl = slice(h * hd, (h + 1) * hd)
        qh = q[:, sl].astype(cdt)                    # (Nq, hd)
        kh = kv[:, h * hd:(h + 1) * hd].astype(cdt)  # (Nk, hd)
        vh = kv[:, d + h * hd:d + (h + 1) * hd].astype(cdt)
        # scores = qh @ kh^T without materializing a transpose
        s = lax.dot_general(qh, kh, (((1,), (1,)), ((), ())),
                            preferred_element_type=jnp.float32)
        s = s - jnp.max(s, axis=-1, keepdims=True)
        p = jnp.exp(s)
        p = p * pl.reciprocal(jnp.sum(p, axis=-1, keepdims=True), approx=True)
        oh = jnp.dot(p.astype(cdt), vh, preferred_element_type=jnp.float32)   # (Nq, hd)
        # fold the output projection per head (replaces concat + single big dot)
        acc = acc + jnp.dot(oh.astype(cdt), wo[sl, :],
                            preferred_element_type=jnp.float32)
    return acc + bo


# ----------------------------------------------------------------------------
# Fused Pallas kernel (whole DecoderBlock for one batch element)
# ----------------------------------------------------------------------------

def _decoder_block_kernel(x_ref, ctx_ref, ss_ref, ln_ref,
                          sa_wq_ref, sa_wkv_ref, sa_wo_ref,
                          sa_bq_ref, sa_bkv_ref, sa_bo_ref,
                          ca_wq_ref, ca_wkv_ref, ca_wo_ref,
                          ca_bq_ref, ca_bkv_ref, ca_bo_ref,
                          w1_ref, b1_ref, w2_ref, b2_ref,
                          o_ref, *, num_heads, compute_dtype):
    x = x_ref[0]                                   # (N, D) f32
    ctx = ctx_ref[0]                               # (M, D) f32
    ss = ss_ref[0]                                 # (6, D): [sc1, sh1, sc2, sh2, sc3, sh3]
    ln = ln_ref[...]                               # (6, D): [g1,  b1,  g2,  b2,  g3,  b3]

    # --- stage 1: CLN1 + self-attention + residual -------------------------
    xn1 = _cln_core(x, ss[0:1, :], ss[1:2, :], ln[0:1, :], ln[1:2, :])
    x1 = x + _mha_core(xn1, xn1,
                       sa_wq_ref[...], sa_wkv_ref[...], sa_wo_ref[...],
                       sa_bq_ref[...], sa_bkv_ref[...], sa_bo_ref[...],
                       num_heads=num_heads, cdt=compute_dtype)

    # --- stage 2: CLN2 + cross-attention + residual -------------------------
    xn2 = _cln_core(x1, ss[2:3, :], ss[3:4, :], ln[2:3, :], ln[3:4, :])
    x2 = x1 + _mha_core(xn2, ctx,
                        ca_wq_ref[...], ca_wkv_ref[...], ca_wo_ref[...],
                        ca_bq_ref[...], ca_bkv_ref[...], ca_bo_ref[...],
                        num_heads=num_heads, cdt=compute_dtype)

    # --- stage 3: CLN3 + FeedForward + residual -----------------------------
    xn3 = _cln_core(x2, ss[4:5, :], ss[5:6, :], ln[4:5, :], ln[5:6, :])
    h = jnp.dot(xn3.astype(compute_dtype), w1_ref[...],
                preferred_element_type=jnp.float32) + b1_ref[...]
    h = _gelu_erf(h)                               # f32 epilogue (v5e-safe)
    y = jnp.dot(h.astype(compute_dtype), w2_ref[...],
                preferred_element_type=jnp.float32) + b2_ref[...]
    o_ref[0] = xn3 + y


# ----------------------------------------------------------------------------
# Wrapper around pallas_call
# ----------------------------------------------------------------------------

def decoder_block_forward(prepared, x, context, noise, num_heads,
                          compute_dtype=jnp.bfloat16):
    B, N, D = x.shape
    M = context.shape[1]
    Dh = prepared["w1"].shape[1]
    assert D % num_heads == 0

    # One fused conditioning matmul for all three CLNs -> (B, 6, D)
    # row layout: [scale1, shift1, scale2, shift2, scale3, shift3]
    ss = (jnp.dot(noise, prepared["ss_w_t"], preferred_element_type=jnp.float32)
          + prepared["ss_b"]).reshape(B, 6, D)

    kern = functools.partial(_decoder_block_kernel,
                             num_heads=num_heads, compute_dtype=compute_dtype)

    dd = pl.BlockSpec((D, D), lambda b: (0, 0))
    d2d = pl.BlockSpec((D, 2 * D), lambda b: (0, 0))
    bd = pl.BlockSpec((1, D), lambda b: (0, 0))
    b2d = pl.BlockSpec((1, 2 * D), lambda b: (0, 0))

    return pl.pallas_call(
        kern,
        out_shape=jax.ShapeDtypeStruct((B, N, D), jnp.float32),
        grid=(B,),
        in_specs=[
            pl.BlockSpec((1, N, D), lambda b: (b, 0, 0)),   # x
            pl.BlockSpec((1, M, D), lambda b: (b, 0, 0)),   # context
            pl.BlockSpec((1, 6, D), lambda b: (b, 0, 0)),   # fused scale/shift
            pl.BlockSpec((6, D), lambda b: (0, 0)),         # packed LN gamma/beta
            dd, d2d, dd, bd, b2d, bd,                       # self-attn  wq wkv wo bq bkv bo
            dd, d2d, dd, bd, b2d, bd,                       # cross-attn wq wkv wo bq bkv bo
            pl.BlockSpec((D, Dh), lambda b: (0, 0)),        # mlp w1
            pl.BlockSpec((1, Dh), lambda b: (0, 0)),        # mlp b1
            pl.BlockSpec((Dh, D), lambda b: (0, 0)),        # mlp w2
            bd,                                             # mlp b2
        ],
        out_specs=pl.BlockSpec((1, N, D), lambda b: (b, 0, 0)),
        compiler_params=pltpu.CompilerParams(dimension_semantics=("parallel",)),
    )(x, context, ss, prepared["ln"],
      prepared["sa_wq"], prepared["sa_wkv"], prepared["sa_wo"],
      prepared["sa_bq"], prepared["sa_bkv"], prepared["sa_bo"],
      prepared["ca_wq"], prepared["ca_wkv"], prepared["ca_wo"],
      prepared["ca_bq"], prepared["ca_bkv"], prepared["ca_bo"],
      prepared["w1"], prepared["b1"], prepared["w2"], prepared["b2"])


# ----------------------------------------------------------------------------
# Parameter preparation (done ONCE, outside the forward)
# ----------------------------------------------------------------------------

def prepare_params(p, num_heads, compute_dtype=jnp.bfloat16):
    """Pre-transpose / pre-split / pre-scale weights; fuse the 3 scale/shift projections."""
    D = p["norm1"]["ln_w"].shape[0]
    hd = D // num_heads
    inv_scale = 1.0 / sqrt(hd)

    def prep_attn(a, pfx):
        w_in, b_in = a["in_w"], a["in_b"]          # torch layout: (3D, D), (3D,)
        wq = (w_in[:D] * inv_scale).T              # fold 1/sqrt(hd) into Q proj
        wk = w_in[D:2 * D].T
        wv = w_in[2 * D:].T
        return {
            pfx + "_wq": wq.astype(compute_dtype),                              # (D, D)
            pfx + "_wkv": jnp.concatenate([wk, wv], axis=1).astype(compute_dtype),  # (D, 2D)
            pfx + "_wo": a["out_w"].T.astype(compute_dtype),                    # (D, D)
            pfx + "_bq": (b_in[:D] * inv_scale).reshape(1, D).astype(jnp.float32),
            pfx + "_bkv": jnp.concatenate([b_in[D:2 * D], b_in[2 * D:]]
                                          ).reshape(1, 2 * D).astype(jnp.float32),
            pfx + "_bo": a["out_b"].reshape(1, D).astype(jnp.float32),
        }

    # Packed LayerNorm affine table (6, D): [g1, b1, g2, b2, g3, b3]
    ln = jnp.stack([p["norm1"]["ln_w"], p["norm1"]["ln_b"],
                    p["norm2"]["ln_w"], p["norm2"]["ln_b"],
                    p["norm3"]["ln_w"], p["norm3"]["ln_b"]], axis=0).astype(jnp.float32)

    Dh = p["mlp"]["w1"].shape[0]
    out = {
        "ln": ln,
        "w1": p["mlp"]["w1"].T.astype(compute_dtype),        # (D, Dh)
        "b1": p["mlp"]["b1"].reshape(1, Dh).astype(jnp.float32),
        "w2": p["mlp"]["w2"].T.astype(compute_dtype),        # (Dh, D)
        "b2": p["mlp"]["b2"].reshape(1, D).astype(jnp.float32),
    }
    out.update(prep_attn(p["self_attn"], "sa"))
    out.update(prep_attn(p["cross_attn"], "ca"))

    # Fused conditioning projection for all three CLNs: (noise_dim -> 6*D).
    ss_w = jnp.concatenate([p["norm1"]["ss_w"], p["norm2"]["ss_w"], p["norm3"]["ss_w"]], 0)
    ss_b = jnp.concatenate([p["norm1"]["ss_b"], p["norm2"]["ss_b"], p["norm3"]["ss_b"]], 0)
    out["ss_w_t"] = ss_w.T.astype(jnp.float32)               # (noise_dim, 6D)
    out["ss_b"] = ss_b.astype(jnp.float32)                   # (6D,)
    return out


# ----------------------------------------------------------------------------
# Deterministic parameter init (synthetic; matches module shapes & torch init)
# ----------------------------------------------------------------------------

def _tn(key, shape, std=0.02):
    return (std * jax.random.truncated_normal(key, -2.0, 2.0, shape)).astype(jnp.float32)


def init_params(key, dim, mlp_ratio, noise_dim):
    hidden = int(dim * mlp_ratio)
    keys = jax.random.split(key, 9)

    def cln(k):
        return {
            "ln_w": jnp.ones((dim,), jnp.float32),
            "ln_b": jnp.zeros((dim,), jnp.float32),
            "ss_w": _tn(k, (2 * dim, noise_dim)),
            "ss_b": jnp.zeros((2 * dim,), jnp.float32),
        }

    def mha(k):
        k1, k2 = jax.random.split(k)
        return {
            "in_w": _tn(k1, (3 * dim, dim), std=0.05),
            "in_b": jnp.zeros((3 * dim,), jnp.float32),
            "out_w": _tn(k2, (dim, dim), std=0.05),
            "out_b": jnp.zeros((dim,), jnp.float32),
        }

    return {
        "norm1": cln(keys[0]),
        "self_attn": mha(keys[1]),
        "norm2": cln(keys[2]),
        "cross_attn": mha(keys[3]),
        "norm3": cln(keys[4]),
        "mlp": {
            "w1": _tn(keys[5], (hidden, dim), std=0.05),
            "b1": jnp.zeros((hidden,), jnp.float32),
            "w2": _tn(keys[6], (dim, hidden), std=0.05),
            "b2": jnp.zeros((dim,), jnp.float32),
        },
    }


# ----------------------------------------------------------------------------
# Pure-JAX reference (numerical verification)
# ----------------------------------------------------------------------------

_HI = lax.Precision.HIGHEST


def _ref_cln(x, noise, p):
    D = x.shape[-1]
    mean = jnp.mean(x, -1, keepdims=True)
    var = jnp.mean((x - mean) ** 2, -1, keepdims=True)
    n = (x - mean) / jnp.sqrt(var + 1e-5) * p["ln_w"] + p["ln_b"]
    ss = jnp.einsum("bn,cn->bc", noise, p["ss_w"], precision=_HI) + p["ss_b"]
    scale = jnp.clip(ss[:, :D], -0.9, 10.0)[:, None, :]
    shift = ss[:, D:][:, None, :]
    return n * (1.0 + scale) + shift


def _ref_mha(q_in, kv_in, p, H):
    B, Nq, D = q_in.shape
    Nk = kv_in.shape[1]
    hd = D // H
    wq, wk, wv = p["in_w"][:D], p["in_w"][D:2 * D], p["in_w"][2 * D:]
    bq, bk, bv = p["in_b"][:D], p["in_b"][D:2 * D], p["in_b"][2 * D:]
    q = jnp.einsum("bnd,ed->bne", q_in, wq, precision=_HI) + bq
    k = jnp.einsum("bnd,ed->bne", kv_in, wk, precision=_HI) + bk
    v = jnp.einsum("bnd,ed->bne", kv_in, wv, precision=_HI) + bv
    q = q.reshape(B, Nq, H, hd).transpose(0, 2, 1, 3)
    k = k.reshape(B, Nk, H, hd).transpose(0, 2, 1, 3)
    v = v.reshape(B, Nk, H, hd).transpose(0, 2, 1, 3)
    s = jnp.einsum("bhqd,bhkd->bhqk", q, k, precision=_HI) / sqrt(hd)
    a = jax.nn.softmax(s, axis=-1)
    o = jnp.einsum("bhqk,bhkd->bhqd", a, v, precision=_HI)
    o = o.transpose(0, 2, 1, 3).reshape(B, Nq, D)
    return jnp.einsum("bnd,ed->bne", o, p["out_w"], precision=_HI) + p["out_b"]


def _ref_decoder_block(params, x, context, noise, H):
    x_n1 = _ref_cln(x, noise, params["norm1"])
    x = x + _ref_mha(x_n1, x_n1, params["self_attn"], H)
    x_n2 = _ref_cln(x, noise, params["norm2"])
    x = x + _ref_mha(x_n2, context, params["cross_attn"], H)
    x = _ref_cln(x, noise, params["norm3"])
    p = params["mlp"]
    h = jnp.einsum("bnd,hd->bnh", x, p["w1"], precision=_HI) + p["b1"]
    h = jax.nn.gelu(h, approximate=False)
    y = jnp.einsum("bnh,dh->bnd", h, p["w2"], precision=_HI) + p["b2"]
    return x + y


# ----------------------------------------------------------------------------

if __name__ == "__main__":
    B, N, M, D, H = 2, 8, 16, 32, 4        # batch, seq, context seq, dim, heads
    mlp_ratio, noise_dim = 2.0, 16

    key = jax.random.PRNGKey(0)
    kx, kc, kn, kp = jax.random.split(key, 4)
    x = jax.random.normal(kx, (B, N, D), jnp.float32)
    context = jax.random.normal(kc, (B, M, D), jnp.float32)
    noise = jax.random.normal(kn, (B, noise_dim), jnp.float32)
    raw_params = init_params(kp, D, mlp_ratio, noise_dim)

    ref = _ref_decoder_block(raw_params, x, context, noise, H)

    # --- f32 MXU operands: tight correctness check ---
    prep_f32 = prepare_params(raw_params, H, jnp.float32)
    fwd_f32 = jax.jit(functools.partial(decoder_block_forward,
                                        num_heads=H, compute_dtype=jnp.float32))
    out_f32 = jax.block_until_ready(fwd_f32(prep_f32, x, context, noise))
    assert out_f32.shape == (B, N, D)
    assert bool(jnp.all(jnp.isfinite(out_f32)))
    np.testing.assert_allclose(np.asarray(out_f32), np.asarray(ref),
                               rtol=5e-3, atol=5e-3)

    # --- bf16 MXU operands (default fast path), f32 accumulation / LN / softmax ---
    prep_bf16 = prepare_params(raw_params, H, jnp.bfloat16)
    fwd_bf16 = jax.jit(functools.partial(decoder_block_forward,
                                         num_heads=H, compute_dtype=jnp.bfloat16))
    out_bf16 = jax.block_until_ready(fwd_bf16(prep_bf16, x, context, noise))
    assert out_bf16.shape == (B, N, D)
    assert bool(jnp.all(jnp.isfinite(out_bf16)))
    np.testing.assert_allclose(np.asarray(out_bf16), np.asarray(ref),
                               rtol=2e-2, atol=2e-2)

    print("KERNEL_OK")
</pallas_src>

<mosaic_0001>
module attributes {stable_mosaic.version = 11 : i64} {
  func.func @_decoder_block_kernel(%arg0: i32, %arg1: memref<1x8x32xf32, #tpu.memory_space<vmem>>, %arg2: memref<1x16x32xf32, #tpu.memory_space<vmem>>, %arg3: memref<1x6x32xf32, #tpu.memory_space<vmem>>, %arg4: memref<6x32xf32, #tpu.memory_space<vmem>>, %arg5: memref<32x32xf32, #tpu.memory_space<vmem>>, %arg6: memref<32x64xf32, #tpu.memory_space<vmem>>, %arg7: memref<32x32xf32, #tpu.memory_space<vmem>>, %arg8: memref<1x32xf32, #tpu.memory_space<vmem>>, %arg9: memref<1x64xf32, #tpu.memory_space<vmem>>, %arg10: memref<1x32xf32, #tpu.memory_space<vmem>>, %arg11: memref<32x32xf32, #tpu.memory_space<vmem>>, %arg12: memref<32x64xf32, #tpu.memory_space<vmem>>, %arg13: memref<32x32xf32, #tpu.memory_space<vmem>>, %arg14: memref<1x32xf32, #tpu.memory_space<vmem>>, %arg15: memref<1x64xf32, #tpu.memory_space<vmem>>, %arg16: memref<1x32xf32, #tpu.memory_space<vmem>>, %arg17: memref<32x64xf32, #tpu.memory_space<vmem>>, %arg18: memref<1x64xf32, #tpu.memory_space<vmem>>, %arg19: memref<64x32xf32, #tpu.memory_space<vmem>>, %arg20: memref<1x32xf32, #tpu.memory_space<vmem>>, %arg21: memref<1x8x32xf32, #tpu.memory_space<vmem>>) attributes {dimension_semantics = [#tpu.dimension_semantics<parallel>], iteration_bounds = array<i64: 2>, scalar_prefetch = 0 : i64, scratch_operands = 0 : i64, tpu.core_type = #tpu.core_type<tc>, window_params = [{transform_indices = @transform_0, window_bounds = array<i64: 1, 8, 32>}, {transform_indices = @transform_1, window_bounds = array<i64: 1, 16, 32>}, {transform_indices = @transform_2, window_bounds = array<i64: 1, 6, 32>}, {pipeline_mode = #tpu.pipeline_mode<synchronous>, transform_indices = @transform_3, window_bounds = array<i64: 6, 32>}, {pipeline_mode = #tpu.pipeline_mode<synchronous>, transform_indices = @transform_4, window_bounds = array<i64: 32, 32>}, {pipeline_mode = #tpu.pipeline_mode<synchronous>, transform_indices = @transform_5, window_bounds = array<i64: 32, 64>}, {pipeline_mode = #tpu.pipeline_mode<synchronous>, transform_indices = @transform_6, window_bounds = array<i64: 32, 32>}, {pipeline_mode = #tpu.pipeline_mode<synchronous>, transform_indices = @transform_7, window_bounds = array<i64: 1, 32>}, {pipeline_mode = #tpu.pipeline_mode<synchronous>, transform_indices = @transform_8, window_bounds = array<i64: 1, 64>}, {pipeline_mode = #tpu.pipeline_mode<synchronous>, transform_indices = @transform_9, window_bounds = array<i64: 1, 32>}, {pipeline_mode = #tpu.pipeline_mode<synchronous>, transform_indices = @transform_10, window_bounds = array<i64: 32, 32>}, {pipeline_mode = #tpu.pipeline_mode<synchronous>, transform_indices = @transform_11, window_bounds = array<i64: 32, 64>}, {pipeline_mode = #tpu.pipeline_mode<synchronous>, transform_indices = @transform_12, window_bounds = array<i64: 32, 32>}, {pipeline_mode = #tpu.pipeline_mode<synchronous>, transform_indices = @transform_13, window_bounds = array<i64: 1, 32>}, {pipeline_mode = #tpu.pipeline_mode<synchronous>, transform_indices = @transform_14, window_bounds = array<i64: 1, 64>}, {pipeline_mode = #tpu.pipeline_mode<synchronous>, transform_indices = @transform_15, window_bounds = array<i64: 1, 32>}, {pipeline_mode = #tpu.pipeline_mode<synchronous>, transform_indices = @transform_16, window_bounds = array<i64: 32, 64>}, {pipeline_mode = #tpu.pipeline_mode<synchronous>, transform_indices = @transform_17, window_bounds = array<i64: 1, 64>}, {pipeline_mode = #tpu.pipeline_mode<synchronous>, transform_indices = @transform_18, window_bounds = array<i64: 64, 32>}, {pipeline_mode = #tpu.pipeline_mode<synchronous>, transform_indices = @transform_19, window_bounds = array<i64: 1, 32>}, {transform_indices = @transform_20, window_bounds = array<i64: 1, 8, 32>}]} {
    %c0 = arith.constant 0 : index
    %c0_0 = arith.constant 0 : index
    %c0_1 = arith.constant 0 : index
    %0 = vector.load %arg1[%c0, %c0_0, %c0_1] : memref<1x8x32xf32, #tpu.memory_space<vmem>>, vector<1x8x32xf32>
    %1 = vector.shape_cast %0 : vector<1x8x32xf32> to vector<8x32xf32>
    %c0_2 = arith.constant 0 : index
    %c0_3 = arith.constant 0 : index
    %c0_4 = arith.constant 0 : index
    %2 = vector.load %arg2[%c0_2, %c0_3, %c0_4] : memref<1x16x32xf32, #tpu.memory_space<vmem>>, vector<1x16x32xf32>
    %3 = vector.shape_cast %2 : vector<1x16x32xf32> to vector<16x32xf32>
    %c0_5 = arith.constant 0 : index
    %c0_6 = arith.constant 0 : index
    %c0_7 = arith.constant 0 : index
    %4 = vector.load %arg3[%c0_5, %c0_6, %c0_7] : memref<1x6x32xf32, #tpu.memory_space<vmem>>, vector<1x6x32xf32>
    %5 = vector.shape_cast %4 : vector<1x6x32xf32> to vector<6x32xf32>
    %c0_8 = arith.constant 0 : index
    %c0_9 = arith.constant 0 : index
    %6 = vector.load %arg4[%c0_8, %c0_9] : memref<6x32xf32, #tpu.memory_space<vmem>>, vector<6x32xf32>
    %7 = vector.extract_strided_slice %5 {offsets = [0, 0], sizes = [1, 32], strides = [1, 1]} : vector<6x32xf32> to vector<1x32xf32>
    %8 = vector.extract_strided_slice %5 {offsets = [1, 0], sizes = [1, 32], strides = [1, 1]} : vector<6x32xf32> to vector<1x32xf32>
    %9 = vector.extract_strided_slice %6 {offsets = [0, 0], sizes = [1, 32], strides = [1, 1]} : vector<6x32xf32> to vector<1x32xf32>
    %10 = vector.extract_strided_slice %6 {offsets = [1, 0], sizes = [1, 32], strides = [1, 1]} : vector<6x32xf32> to vector<1x32xf32>
    %cst = arith.constant dense<0.000000e+00> : vector<8xf32>
    %11 = vector.multi_reduction <add>, %1, %cst [1] : vector<8x32xf32> to vector<8xf32>
    %12 = vector.shape_cast %11 : vector<8xf32> to vector<8x1xf32>
    %cst_10 = arith.constant 3.200000e+01 : f32
    %13 = vector.broadcast %cst_10 : f32 to vector<8x1xf32>
    %14 = arith.divf %12, %13 : vector<8x1xf32>
    %15 = vector.broadcast %14 : vector<8x1xf32> to vector<8x32xf32>
    %16 = arith.subf %1, %15 : vector<8x32xf32>
    %17 = arith.mulf %16, %16 : vector<8x32xf32>
    %cst_11 = arith.constant dense<0.000000e+00> : vector<8xf32>
    %18 = vector.multi_reduction <add>, %17, %cst_11 [1] : vector<8x32xf32> to vector<8xf32>
    %19 = vector.shape_cast %18 : vector<8xf32> to vector<8x1xf32>
    %cst_12 = arith.constant 3.200000e+01 : f32
    %20 = vector.broadcast %cst_12 : f32 to vector<8x1xf32>
    %21 = arith.divf %19, %20 : vector<8x1xf32>
    %22 = vector.broadcast %14 : vector<8x1xf32> to vector<8x32xf32>
    %23 = arith.subf %1, %22 : vector<8x32xf32>
    %cst_13 = arith.constant 9.99999974E-6 : f32
    %24 = vector.broadcast %cst_13 : f32 to vector<8x1xf32>
    %25 = arith.addf %21, %24 : vector<8x1xf32>
    %26 = math.rsqrt %25 : vector<8x1xf32>
    %27 = vector.broadcast %26 : vector<8x1xf32> to vector<8x32xf32>
    %28 = arith.mulf %23, %27 : vector<8x32xf32>
    %29 = vector.broadcast %9 : vector<1x32xf32> to vector<8x32xf32>
    %30 = arith.mulf %28, %29 : vector<8x32xf32>
    %31 = vector.broadcast %10 : vector<1x32xf32> to vector<8x32xf32>
    %32 = arith.addf %30, %31 : vector<8x32xf32>
    %cst_14 = arith.constant -0.899999976 : f32
    %cst_15 = arith.constant 1.000000e+01 : f32
    %33 = vector.broadcast %cst_14 : f32 to vector<1x32xf32>
    %34 = arith.maximumf %33, %7 : vector<1x32xf32>
    %35 = vector.broadcast %cst_15 : f32 to vector<1x32xf32>
    %36 = arith.minimumf %35, %34 : vector<1x32xf32>
    %cst_16 = arith.constant 1.000000e+00 : f32
    %37 = vector.broadcast %cst_16 : f32 to vector<1x32xf32>
    %38 = arith.addf %37, %36 : vector<1x32xf32>
    %39 = vector.broadcast %38 : vector<1x32xf32> to vector<8x32xf32>
    %40 = arith.mulf %32, %39 : vector<8x32xf32>
    %41 = vector.broadcast %8 : vector<1x32xf32> to vector<8x32xf32>
    %42 = arith.addf %40, %41 : vector<8x32xf32>
    %c0_17 = arith.constant 0 : index
    %c0_18 = arith.constant 0 : index
    %43 = vector.load %arg5[%c0_17, %c0_18] : memref<32x32xf32, #tpu.memory_space<vmem>>, vector<32x32xf32>
    %c0_19 = arith.constant 0 : index
    %c0_20 = arith.constant 0 : index
    %44 = vector.load %arg6[%c0_19, %c0_20] : memref<32x64xf32, #tpu.memory_space<vmem>>, vector<32x64xf32>
    %c0_21 = arith.constant 0 : index
    %c0_22 = arith.constant 0 : index
    %45 = vector.load %arg7[%c0_21, %c0_22] : memref<32x32xf32, #tpu.memory_space<vmem>>, vector<32x32xf32>
    %c0_23 = arith.constant 0 : index
    %c0_24 = arith.constant 0 : index
    %46 = vector.load %arg8[%c0_23, %c0_24] : memref<1x32xf32, #tpu.memory_space<vmem>>, vector<1x32xf32>
    %c0_25 = arith.constant 0 : index
    %c0_26 = arith.constant 0 : index
    %47 = vector.load %arg9[%c0_25, %c0_26] : memref<1x64xf32, #tpu.memory_space<vmem>>, vector<1x64xf32>
    %c0_27 = arith.constant 0 : index
    %c0_28 = arith.constant 0 : index
    %48 = vector.load %arg10[%c0_27, %c0_28] : memref<1x32xf32, #tpu.memory_space<vmem>>, vector<1x32xf32>
    %cst_29 = arith.constant dense<0.000000e+00> : vector<8x32xf32>
    %49 = tpu.matmul %42, %43, %cst_29 {dimension_numbers = #tpu.dot_dimension_numbers<[1], [0], [0], [1], [0, 0, 1, 1], [], []>} : vector<8x32xf32>, vector<32x32xf32>, vector<8x32xf32> -> vector<8x32xf32>
    %50 = vector.broadcast %46 : vector<1x32xf32> to vector<8x32xf32>
    %51 = arith.addf %49, %50 : vector<8x32xf32>
    %cst_30 = arith.constant dense<0.000000e+00> : vector<8x64xf32>
    %52 = tpu.matmul %42, %44, %cst_30 {dimension_numbers = #tpu.dot_dimension_numbers<[1], [0], [0], [1], [0, 0, 1, 1], [], []>} : vector<8x32xf32>, vector<32x64xf32>, vector<8x64xf32> -> vector<8x64xf32>
    %53 = vector.broadcast %47 : vector<1x64xf32> to vector<8x64xf32>
    %54 = arith.addf %52, %53 : vector<8x64xf32>
    %cst_31 = arith.constant 0.000000e+00 : f32
    %55 = vector.broadcast %cst_31 : f32 to vector<8x32xf32>
    %56 = vector.extract_strided_slice %51 {offsets = [0, 0], sizes = [8, 8], strides = [1, 1]} : vector<8x32xf32> to vector<8x8xf32>
    %57 = vector.extract_strided_slice %54 {offsets = [0, 0], sizes = [8, 8], strides = [1, 1]} : vector<8x64xf32> to vector<8x8xf32>
    %58 = vector.extract_strided_slice %54 {offsets = [0, 32], sizes = [8, 8], strides = [1, 1]} : vector<8x64xf32> to vector<8x8xf32>
    %cst_32 = arith.constant dense<0.000000e+00> : vector<8x8xf32>
    %59 = tpu.matmul %56, %57, %cst_32 {dimension_numbers = #tpu.dot_dimension_numbers<[1], [1], [0], [0], [0, 0, 1, 0], [], []>} : vector<8x8xf32>, vector<8x8xf32>, vector<8x8xf32> -> vector<8x8xf32>
    %cst_33 = arith.constant dense<0xFF800000> : vector<8xf32>
    %60 = vector.multi_reduction <maximumf>, %59, %cst_33 [1] : vector<8x8xf32> to vector<8xf32>
    %61 = vector.shape_cast %60 : vector<8xf32> to vector<8x1xf32>
    %62 = vector.broadcast %61 : vector<8x1xf32> to vector<8x8xf32>
    %63 = arith.subf %59, %62 : vector<8x8xf32>
    %64 = math.exp %63 : vector<8x8xf32>
    %cst_34 = arith.constant dense<0.000000e+00> : vector<8xf32>
    %65 = vector.multi_reduction <add>, %64, %cst_34 [1] : vector<8x8xf32> to vector<8xf32>
    %66 = vector.shape_cast %65 : vector<8xf32> to vector<8x1xf32>
    %67 = tpu.reciprocal %66 {approx = true} : vector<8x1xf32> -> vector<8x1xf32>
    %68 = vector.broadcast %67 : vector<8x1xf32> to vector<8x8xf32>
    %69 = arith.mulf %64, %68 : vector<8x8xf32>
    %cst_35 = arith.constant dense<0.000000e+00> : vector<8x8xf32>
    %70 = tpu.matmul %69, %58, %cst_35 {dimension_numbers = #tpu.dot_dimension_numbers<[1], [0], [0], [1], [0, 0, 1, 1], [], []>} : vector<8x8xf32>, vector<8x8xf32>, vector<8x8xf32> -> vector<8x8xf32>
    %71 = vector.extract_strided_slice %45 {offsets = [0, 0], sizes = [8, 32], strides = [1, 1]} : vector<32x32xf32> to vector<8x32xf32>
    %cst_36 = arith.constant dense<0.000000e+00> : vector<8x32xf32>
    %72 = tpu.matmul %70, %71, %cst_36 {dimension_numbers = #tpu.dot_dimension_numbers<[1], [0], [0], [1], [0, 0, 1, 1], [], []>} : vector<8x8xf32>, vector<8x32xf32>, vector<8x32xf32> -> vector<8x32xf32>
    %73 = arith.addf %55, %72 : vector<8x32xf32>
    %74 = vector.extract_strided_slice %51 {offsets = [0, 8], sizes = [8, 8], strides = [1, 1]} : vector<8x32xf32> to vector<8x8xf32>
    %75 = vector.extract_strided_slice %54 {offsets = [0, 8], sizes = [8, 8], strides = [1, 1]} : vector<8x64xf32> to vector<8x8xf32>
    %76 = vector.extract_strided_slice %54 {offsets = [0, 40], sizes = [8, 8], strides = [1, 1]} : vector<8x64xf32> to vector<8x8xf32>
    %cst_37 = arith.constant dense<0.000000e+00> : vector<8x8xf32>
    %77 = tpu.matmul %74, %75, %cst_37 {dimension_numbers = #tpu.dot_dimension_numbers<[1], [1], [0], [0], [0, 0, 1, 0], [], []>} : vector<8x8xf32>, vector<8x8xf32>, vector<8x8xf32> -> vector<8x8xf32>
    %cst_38 = arith.constant dense<0xFF800000> : vector<8xf32>
    %78 = vector.multi_reduction <maximumf>, %77, %cst_38 [1] : vector<8x8xf32> to vector<8xf32>
    %79 = vector.shape_cast %78 : vector<8xf32> to vector<8x1xf32>
    %80 = vector.broadcast %79 : vector<8x1xf32> to vector<8x8xf32>
    %81 = arith.subf %77, %80 : vector<8x8xf32>
    %82 = math.exp %81 : vector<8x8xf32>
    %cst_39 = arith.constant dense<0.000000e+00> : vector<8xf32>
    %83 = vector.multi_reduction <add>, %82, %cst_39 [1] : vector<8x8xf32> to vector<8xf32>
    %84 = vector.shape_cast %83 : vector<8xf32> to vector<8x1xf32>
    %85 = tpu.reciprocal %84 {approx = true} : vector<8x1xf32> -> vector<8x1xf32>
    %86 = vector.broadcast %85 : vector<8x1xf32> to vector<8x8xf32>
    %87 = arith.mulf %82, %86 : vector<8x8xf32>
    %cst_40 = arith.constant dense<0.000000e+00> : vector<8x8xf32>
    %88 = tpu.matmul %87, %76, %cst_40 {dimension_numbers = #tpu.dot_dimension_numbers<[1], [0], [0], [1], [0, 0, 1, 1], [], []>} : vector<8x8xf32>, vector<8x8xf32>, vector<8x8xf32> -> vector<8x8xf32>
    %89 = vector.extract_strided_slice %45 {offsets = [8, 0], sizes = [8, 32], strides = [1, 1]} : vector<32x32xf32> to vector<8x32xf32>
    %cst_41 = arith.constant dense<0.000000e+00> : vector<8x32xf32>
    %90 = tpu.matmul %88, %89, %cst_41 {dimension_numbers = #tpu.dot_dimension_numbers<[1], [0], [0], [1], [0, 0, 1, 1], [], []>} : vector<8x8xf32>, vector<8x32xf32>, vector<8x32xf32> -> vector<8x32xf32>
    %91 = arith.addf %73, %90 : vector<8x32xf32>
    %92 = vector.extract_strided_slice %51 {offsets = [0, 16], sizes = [8, 8], strides = [1, 1]} : vector<8x32xf32> to vector<8x8xf32>
    %93 = vector.extract_strided_slice %54 {offsets = [0, 16], sizes = [8, 8], strides = [1, 1]} : vector<8x64xf32> to vector<8x8xf32>
    %94 = vector.extract_strided_slice %54 {offsets = [0, 48], sizes = [8, 8], strides = [1, 1]} : vector<8x64xf32> to vector<8x8xf32>
    %cst_42 = arith.constant dense<0.000000e+00> : vector<8x8xf32>
    %95 = tpu.matmul %92, %93, %cst_42 {dimension_numbers = #tpu.dot_dimension_numbers<[1], [1], [0], [0], [0, 0, 1, 0], [], []>} : vector<8x8xf32>, vector<8x8xf32>, vector<8x8xf32> -> vector<8x8xf32>
    %cst_43 = arith.constant dense<0xFF800000> : vector<8xf32>
    %96 = vector.multi_reduction <maximumf>, %95, %cst_43 [1] : vector<8x8xf32> to vector<8xf32>
    %97 = vector.shape_cast %96 : vector<8xf32> to vector<8x1xf32>
    %98 = vector.broadcast %97 : vector<8x1xf32> to vector<8x8xf32>
    %99 = arith.subf %95, %98 : vector<8x8xf32>
    %100 = math.exp %99 : vector<8x8xf32>
    %cst_44 = arith.constant dense<0.000000e+00> : vector<8xf32>
    %101 = vector.multi_reduction <add>, %100, %cst_44 [1] : vector<8x8xf32> to vector<8xf32>
    %102 = vector.shape_cast %101 : vector<8xf32> to vector<8x1xf32>
    %103 = tpu.reciprocal %102 {approx = true} : vector<8x1xf32> -> vector<8x1xf32>
    %104 = vector.broadcast %103 : vector<8x1xf32> to vector<8x8xf32>
    %105 = arith.mulf %100, %104 : vector<8x8xf32>
    %cst_45 = arith.constant dense<0.000000e+00> : vector<8x8xf32>
    %106 = tpu.matmul %105, %94, %cst_45 {dimension_numbers = #tpu.dot_dimension_numbers<[1], [0], [0], [1], [0, 0, 1, 1], [], []>} : vector<8x8xf32>, vector<8x8xf32>, vector<8x8xf32> -> vector<8x8xf32>
    %107 = vector.extract_strided_slice %45 {offsets = [16, 0], sizes = [8, 32], strides = [1, 1]} : vector<32x32xf32> to vector<8x32xf32>
    %cst_46 = arith.constant dense<0.000000e+00> : vector<8x32xf32>
    %108 = tpu.matmul %106, %107, %cst_46 {dimension_numbers = #tpu.dot_dimension_numbers<[1], [0], [0], [1], [0, 0, 1, 1], [], []>} : vector<8x8xf32>, vector<8x32xf32>, vector<8x32xf32> -> vector<8x32xf32>
    %109 = arith.addf %91, %108 : vector<8x32xf32>
    %110 = vector.extract_strided_slice %51 {offsets = [0, 24], sizes = [8, 8], strides = [1, 1]} : vector<8x32xf32> to vector<8x8xf32>
    %111 = vector.extract_strided_slice %54 {offsets = [0, 24], sizes = [8, 8], strides = [1, 1]} : vector<8x64xf32> to vector<8x8xf32>
    %112 = vector.extract_strided_slice %54 {offsets = [0, 56], sizes = [8, 8], strides = [1, 1]} : vector<8x64xf32> to vector<8x8xf32>
    %cst_47 = arith.constant dense<0.000000e+00> : vector<8x8xf32>
    %113 = tpu.matmul %110, %111, %cst_47 {dimension_numbers = #tpu.dot_dimension_numbers<[1], [1], [0], [0], [0, 0, 1, 0], [], []>} : vector<8x8xf32>, vector<8x8xf32>, vector<8x8xf32> -> vector<8x8xf32>
    %cst_48 = arith.constant dense<0xFF800000> : vector<8xf32>
    %114 = vector.multi_reduction <maximumf>, %113, %cst_48 [1] : vector<8x8xf32> to vector<8xf32>
    %115 = vector.shape_cast %114 : vector<8xf32> to vector<8x1xf32>
    %116 = vector.broadcast %115 : vector<8x1xf32> to vector<8x8xf32>
    %117 = arith.subf %113, %116 : vector<8x8xf32>
    %118 = math.exp %117 : vector<8x8xf32>
    %cst_49 = arith.constant dense<0.000000e+00> : vector<8xf32>
    %119 = vector.multi_reduction <add>, %118, %cst_49 [1] : vector<8x8xf32> to vector<8xf32>
    %120 = vector.shape_cast %119 : vector<8xf32> to vector<8x1xf32>
    %121 = tpu.reciprocal %120 {approx = true} : vector<8x1xf32> -> vector<8x1xf32>
    %122 = vector.broadcast %121 : vector<8x1xf32> to vector<8x8xf32>
    %123 = arith.mulf %118, %122 : vector<8x8xf32>
    %cst_50 = arith.constant dense<0.000000e+00> : vector<8x8xf32>
    %124 = tpu.matmul %123, %112, %cst_50 {dimension_numbers = #tpu.dot_dimension_numbers<[1], [0], [0], [1], [0, 0, 1, 1], [], []>} : vector<8x8xf32>, vector<8x8xf32>, vector<8x8xf32> -> vector<8x8xf32>
    %125 = vector.extract_strided_slice %45 {offsets = [24, 0], sizes = [8, 32], strides = [1, 1]} : vector<32x32xf32> to vector<8x32xf32>
    %cst_51 = arith.constant dense<0.000000e+00> : vector<8x32xf32>
    %126 = tpu.matmul %124, %125, %cst_51 {dimension_numbers = #tpu.dot_dimension_numbers<[1], [0], [0], [1], [0, 0, 1, 1], [], []>} : vector<8x8xf32>, vector<8x32xf32>, vector<8x32xf32> -> vector<8x32xf32>
    %127 = arith.addf %109, %126 : vector<8x32xf32>
    %128 = vector.broadcast %48 : vector<1x32xf32> to vector<8x32xf32>
    %129 = arith.addf %127, %128 : vector<8x32xf32>
    %130 = arith.addf %1, %129 : vector<8x32xf32>
    %131 = vector.extract_strided_slice %5 {offsets = [2, 0], sizes = [1, 32], strides = [1, 1]} : vector<6x32xf32> to vector<1x32xf32>
    %132 = vector.extract_strided_slice %5 {offsets = [3, 0], sizes = [1, 32], strides = [1, 1]} : vector<6x32xf32> to vector<1x32xf32>
    %133 = vector.extract_strided_slice %6 {offsets = [2, 0], sizes = [1, 32], strides = [1, 1]} : vector<6x32xf32> to vector<1x32xf32>
    %134 = vector.extract_strided_slice %6 {offsets = [3, 0], sizes = [1, 32], strides = [1, 1]} : vector<6x32xf32> to vector<1x32xf32>
    %cst_52 = arith.constant dense<0.000000e+00> : vector<8xf32>
    %135 = vector.multi_reduction <add>, %130, %cst_52 [1] : vector<8x32xf32> to vector<8xf32>
    %136 = vector.shape_cast %135 : vector<8xf32> to vector<8x1xf32>
    %cst_53 = arith.constant 3.200000e+01 : f32
    %137 = vector.broadcast %cst_53 : f32 to vector<8x1xf32>
    %138 = arith.divf %136, %137 : vector<8x1xf32>
    %139 = vector.broadcast %138 : vector<8x1xf32> to vector<8x32xf32>
    %140 = arith.subf %130, %139 : vector<8x32xf32>
    %141 = arith.mulf %140, %140 : vector<8x32xf32>
    %cst_54 = arith.constant dense<0.000000e+00> : vector<8xf32>
    %142 = vector.multi_reduction <add>, %141, %cst_54 [1] : vector<8x32xf32> to vector<8xf32>
    %143 = vector.shape_cast %142 : vector<8xf32> to vector<8x1xf32>
    %cst_55 = arith.constant 3.200000e+01 : f32
    %144 = vector.broadcast %cst_55 : f32 to vector<8x1xf32>
    %145 = arith.divf %143, %144 : vector<8x1xf32>
    %146 = vector.broadcast %138 : vector<8x1xf32> to vector<8x32xf32>
    %147 = arith.subf %130, %146 : vector<8x32xf32>
    %cst_56 = arith.constant 9.99999974E-6 : f32
    %148 = vector.broadcast %cst_56 : f32 to vector<8x1xf32>
    %149 = arith.addf %145, %148 : vector<8x1xf32>
    %150 = math.rsqrt %149 : vector<8x1xf32>
    %151 = vector.broadcast %150 : vector<8x1xf32> to vector<8x32xf32>
    %152 = arith.mulf %147, %151 : vector<8x32xf32>
    %153 = vector.broadcast %133 : vector<1x32xf32> to vector<8x32xf32>
    %154 = arith.mulf %152, %153 : vector<8x32xf32>
    %155 = vector.broadcast %134 : vector<1x32xf32> to vector<8x32xf32>
    %156 = arith.addf %154, %155 : vector<8x32xf32>
    %cst_57 = arith.constant -0.899999976 : f32
    %cst_58 = arith.constant 1.000000e+01 : f32
    %157 = vector.broadcast %cst_57 : f32 to vector<1x32xf32>
    %158 = arith.maximumf %157, %131 : vector<1x32xf32>
    %159 = vector.broadcast %cst_58 : f32 to vector<1x32xf32>
    %160 = arith.minimumf %159, %158 : vector<1x32xf32>
    %cst_59 = arith.constant 1.000000e+00 : f32
    %161 = vector.broadcast %cst_59 : f32 to vector<1x32xf32>
    %162 = arith.addf %161, %160 : vector<1x32xf32>
    %163 = vector.broadcast %162 : vector<1x32xf32> to vector<8x32xf32>
    %164 = arith.mulf %156, %163 : vector<8x32xf32>
    %165 = vector.broadcast %132 : vector<1x32xf32> to vector<8x32xf32>
    %166 = arith.addf %164, %165 : vector<8x32xf32>
    %c0_60 = arith.constant 0 : index
    %c0_61 = arith.constant 0 : index
    %167 = vector.load %arg11[%c0_60, %c0_61] : memref<32x32xf32, #tpu.memory_space<vmem>>, vector<32x32xf32>
    %c0_62 = arith.constant 0 : index
    %c0_63 = arith.constant 0 : index
    %168 = vector.load %arg12[%c0_62, %c0_63] : memref<32x64xf32, #tpu.memory_space<vmem>>, vector<32x64xf32>
    %c0_64 = arith.constant 0 : index
    %c0_65 = arith.constant 0 : index
    %169 = vector.load %arg13[%c0_64, %c0_65] : memref<32x32xf32, #tpu.memory_space<vmem>>, vector<32x32xf32>
    %c0_66 = arith.constant 0 : index
    %c0_67 = arith.constant 0 : index
    %170 = vector.load %arg14[%c0_66, %c0_67] : memref<1x32xf32, #tpu.memory_space<vmem>>, vector<1x32xf32>
    %c0_68 = arith.constant 0 : index
    %c0_69 = arith.constant 0 : index
    %171 = vector.load %arg15[%c0_68, %c0_69] : memref<1x64xf32, #tpu.memory_space<vmem>>, vector<1x64xf32>
    %c0_70 = arith.constant 0 : index
    %c0_71 = arith.constant 0 : index
    %172 = vector.load %arg16[%c0_70, %c0_71] : memref<1x32xf32, #tpu.memory_space<vmem>>, vector<1x32xf32>
    %cst_72 = arith.constant dense<0.000000e+00> : vector<8x32xf32>
    %173 = tpu.matmul %166, %167, %cst_72 {dimension_numbers = #tpu.dot_dimension_numbers<[1], [0], [0], [1], [0, 0, 1, 1], [], []>} : vector<8x32xf32>, vector<32x32xf32>, vector<8x32xf32> -> vector<8x32xf32>
    %174 = vector.broadcast %170 : vector<1x32xf32> to vector<8x32xf32>
    %175 = arith.addf %173, %174 : vector<8x32xf32>
    %cst_73 = arith.constant dense<0.000000e+00> : vector<16x64xf32>
    %176 = tpu.matmul %3, %168, %cst_73 {dimension_numbers = #tpu.dot_dimension_numbers<[1], [0], [0], [1], [0, 0, 1, 1], [], []>} : vector<16x32xf32>, vector<32x64xf32>, vector<16x64xf32> -> vector<16x64xf32>
    %177 = vector.broadcast %171 : vector<1x64xf32> to vector<16x64xf32>
    %178 = arith.addf %176, %177 : vector<16x64xf32>
    %cst_74 = arith.constant 0.000000e+00 : f32
    %179 = vector.broadcast %cst_74 : f32 to vector<8x32xf32>
    %180 = vector.extract_strided_slice %175 {offsets = [0, 0], sizes = [8, 8], strides = [1, 1]} : vector<8x32xf32> to vector<8x8xf32>
    %181 = vector.extract_strided_slice %178 {offsets = [0, 0], sizes = [16, 8], strides = [1, 1]} : vector<16x64xf32> to vector<16x8xf32>
    %182 = vector.extract_strided_slice %178 {offsets = [0, 32], sizes = [16, 8], strides = [1, 1]} : vector<16x64xf32> to vector<16x8xf32>
    %cst_75 = arith.constant dense<0.000000e+00> : vector<8x16xf32>
    %183 = tpu.matmul %180, %181, %cst_75 {dimension_numbers = #tpu.dot_dimension_numbers<[1], [1], [0], [0], [0, 0, 1, 0], [], []>} : vector<8x8xf32>, vector<16x8xf32>, vector<8x16xf32> -> vector<8x16xf32>
    %cst_76 = arith.constant dense<0xFF800000> : vector<8xf32>
    %184 = vector.multi_reduction <maximumf>, %183, %cst_76 [1] : vector<8x16xf32> to vector<8xf32>
    %185 = vector.shape_cast %184 : vector<8xf32> to vector<8x1xf32>
    %186 = vector.broadcast %185 : vector<8x1xf32> to vector<8x16xf32>
    %187 = arith.subf %183, %186 : vector<8x16xf32>
    %188 = math.exp %187 : vector<8x16xf32>
    %cst_77 = arith.constant dense<0.000000e+00> : vector<8xf32>
    %189 = vector.multi_reduction <add>, %188, %cst_77 [1] : vector<8x16xf32> to vector<8xf32>
    %190 = vector.shape_cast %189 : vector<8xf32> to vector<8x1xf32>
    %191 = tpu.reciprocal %190 {approx = true} : vector<8x1xf32> -> vector<8x1xf32>
    %192 = vector.broadcast %191 : vector<8x1xf32> to vector<8x16xf32>
    %193 = arith.mulf %188, %192 : vector<8x16xf32>
    %cst_78 = arith.constant dense<0.000000e+00> : vector<8x8xf32>
    %194 = tpu.matmul %193, %182, %cst_78 {dimension_numbers = #tpu.dot_dimension_numbers<[1], [0], [0], [1], [0, 0, 1, 1], [], []>} : vector<8x16xf32>, vector<16x8xf32>, vector<8x8xf32> -> vector<8x8xf32>
    %195 = vector.extract_strided_slice %169 {offsets = [0, 0], sizes = [8, 32], strides = [1, 1]} : vector<32x32xf32> to vector<8x32xf32>
    %cst_79 = arith.constant dense<0.000000e+00> : vector<8x32xf32>
    %196 = tpu.matmul %194, %195, %cst_79 {dimension_numbers = #tpu.dot_dimension_numbers<[1], [0], [0], [1], [0, 0, 1, 1], [], []>} : vector<8x8xf32>, vector<8x32xf32>, vector<8x32xf32> -> vector<8x32xf32>
    %197 = arith.addf %179, %196 : vector<8x32xf32>
    %198 = vector.extract_strided_slice %175 {offsets = [0, 8], sizes = [8, 8], strides = [1, 1]} : vector<8x32xf32> to vector<8x8xf32>
    %199 = vector.extract_strided_slice %178 {offsets = [0, 8], sizes = [16, 8], strides = [1, 1]} : vector<16x64xf32> to vector<16x8xf32>
    %200 = vector.extract_strided_slice %178 {offsets = [0, 40], sizes = [16, 8], strides = [1, 1]} : vector<16x64xf32> to vector<16x8xf32>
    %cst_80 = arith.constant dense<0.000000e+00> : vector<8x16xf32>
    %201 = tpu.matmul %198, %199, %cst_80 {dimension_numbers = #tpu.dot_dimension_numbers<[1], [1], [0], [0], [0, 0, 1, 0], [], []>} : vector<8x8xf32>, vector<16x8xf32>, vector<8x16xf32> -> vector<8x16xf32>
    %cst_81 = arith.constant dense<0xFF800000> : vector<8xf32>
    %202 = vector.multi_reduction <maximumf>, %201, %cst_81 [1] : vector<8x16xf32> to vector<8xf32>
    %203 = vector.shape_cast %202 : vector<8xf32> to vector<8x1xf32>
    %204 = vector.broadcast %203 : vector<8x1xf32> to vector<8x16xf32>
    %205 = arith.subf %201, %204 : vector<8x16xf32>
    %206 = math.exp %205 : vector<8x16xf32>
    %cst_82 = arith.constant dense<0.000000e+00> : vector<8xf32>
    %207 = vector.multi_reduction <add>, %206, %cst_82 [1] : vector<8x16xf32> to vector<8xf32>
    %208 = vector.shape_cast %207 : vector<8xf32> to vector<8x1xf32>
    %209 = tpu.reciprocal %208 {approx = true} : vector<8x1xf32> -> vector<8x1xf32>
    %210 = vector.broadcast %209 : vector<8x1xf32> to vector<8x16xf32>
    %211 = arith.mulf %206, %210 : vector<8x16xf32>
    %cst_83 = arith.constant dense<0.000000e+00> : vector<8x8xf32>
    %212 = tpu.matmul %211, %200, %cst_83 {dimension_numbers = #tpu.dot_dimension_numbers<[1], [0], [0], [1], [0, 0, 1, 1], [], []>} : vector<8x16xf32>, vector<16x8xf32>, vector<8x8xf32> -> vector<8x8xf32>
    %213 = vector.extract_strided_slice %169 {offsets = [8, 0], sizes = [8, 32], strides = [1, 1]} : vector<32x32xf32> to vector<8x32xf32>
    %cst_84 = arith.constant dense<0.000000e+00> : vector<8x32xf32>
    %214 = tpu.matmul %212, %213, %cst_84 {dimension_numbers = #tpu.dot_dimension_numbers<[1], [0], [0], [1], [0, 0, 1, 1], [], []>} : vector<8x8xf32>, vector<8x32xf32>, vector<8x32xf32> -> vector<8x32xf32>
    %215 = arith.addf %197, %214 : vector<8x32xf32>
    %216 = vector.extract_strided_slice %175 {offsets = [0, 16], sizes = [8, 8], strides = [1, 1]} : vector<8x32xf32> to vector<8x8xf32>
    %217 = vector.extract_strided_slice %178 {offsets = [0, 16], sizes = [16, 8], strides = [1, 1]} : vector<16x64xf32> to vector<16x8xf32>
    %218 = vector.extract_strided_slice %178 {offsets = [0, 48], sizes = [16, 8], strides = [1, 1]} : vector<16x64xf32> to vector<16x8xf32>
    %cst_85 = arith.constant dense<0.000000e+00> : vector<8x16xf32>
    %219 = tpu.matmul %216, %217, %cst_85 {dimension_numbers = #tpu.dot_dimension_numbers<[1], [1], [0], [0], [0, 0, 1, 0], [], []>} : vector<8x8xf32>, vector<16x8xf32>, vector<8x16xf32> -> vector<8x16xf32>
    %cst_86 = arith.constant dense<0xFF800000> : vector<8xf32>
    %220 = vector.multi_reduction <maximumf>, %219, %cst_86 [1] : vector<8x16xf32> to vector<8xf32>
    %221 = vector.shape_cast %220 : vector<8xf32> to vector<8x1xf32>
    %222 = vector.broadcast %221 : vector<8x1xf32> to vector<8x16xf32>
    %223 = arith.subf %219, %222 : vector<8x16xf32>
    %224 = math.exp %223 : vector<8x16xf32>
    %cst_87 = arith.constant dense<0.000000e+00> : vector<8xf32>
    %225 = vector.multi_reduction <add>, %224, %cst_87 [1] : vector<8x16xf32> to vector<8xf32>
    %226 = vector.shape_cast %225 : vector<8xf32> to vector<8x1xf32>
    %227 = tpu.reciprocal %226 {approx = true} : vector<8x1xf32> -> vector<8x1xf32>
    %228 = vector.broadcast %227 : vector<8x1xf32> to vector<8x16xf32>
    %229 = arith.mulf %224, %228 : vector<8x16xf32>
    %cst_88 = arith.constant dense<0.000000e+00> : vector<8x8xf32>
    %230 = tpu.matmul %229, %218, %cst_88 {dimension_numbers = #tpu.dot_dimension_numbers<[1], [0], [0], [1], [0, 0, 1, 1], [], []>} : vector<8x16xf32>, vector<16x8xf32>, vector<8x8xf32> -> vector<8x8xf32>
    %231 = vector.extract_strided_slice %169 {offsets = [16, 0], sizes = [8, 32], strides = [1, 1]} : vector<32x32xf32> to vector<8x32xf32>
    %cst_89 = arith.constant dense<0.000000e+00> : vector<8x32xf32>
    %232 = tpu.matmul %230, %231, %cst_89 {dimension_numbers = #tpu.dot_dimension_numbers<[1], [0], [0], [1], [0, 0, 1, 1], [], []>} : vector<8x8xf32>, vector<8x32xf32>, vector<8x32xf32> -> vector<8x32xf32>
    %233 = arith.addf %215, %232 : vector<8x32xf32>
    %234 = vector.extract_strided_slice %175 {offsets = [0, 24], sizes = [8, 8], strides = [1, 1]} : vector<8x32xf32> to vector<8x8xf32>
    %235 = vector.extract_strided_slice %178 {offsets = [0, 24], sizes = [16, 8], strides = [1, 1]} : vector<16x64xf32> to vector<16x8xf32>
    %236 = vector.extract_strided_slice %178 {offsets = [0, 56], sizes = [16, 8], strides = [1, 1]} : vector<16x64xf32> to vector<16x8xf32>
    %cst_90 = arith.constant dense<0.000000e+00> : vector<8x16xf32>
    %237 = tpu.matmul %234, %235, %cst_90 {dimension_numbers = #tpu.dot_dimension_numbers<[1], [1], [0], [0], [0, 0, 1, 0], [], []>} : vector<8x8xf32>, vector<16x8xf32>, vector<8x16xf32> -> vector<8x16xf32>
    %cst_91 = arith.constant dense<0xFF800000> : vector<8xf32>
    %238 = vector.multi_reduction <maximumf>, %237, %cst_91 [1] : vector<8x16xf32> to vector<8xf32>
    %239 = vector.shape_cast %238 : vector<8xf32> to vector<8x1xf32>
    %240 = vector.broadcast %239 : vector<8x1xf32> to vector<8x16xf32>
    %241 = arith.subf %237, %240 : vector<8x16xf32>
    %242 = math.exp %241 : vector<8x16xf32>
    %cst_92 = arith.constant dense<0.000000e+00> : vector<8xf32>
    %243 = vector.multi_reduction <add>, %242, %cst_92 [1] : vector<8x16xf32> to vector<8xf32>
    %244 = vector.shape_cast %243 : vector<8xf32> to vector<8x1xf32>
    %245 = tpu.reciprocal %244 {approx = true} : vector<8x1xf32> -> vector<8x1xf32>
    %246 = vector.broadcast %245 : vector<8x1xf32> to vector<8x16xf32>
    %247 = arith.mulf %242, %246 : vector<8x16xf32>
    %cst_93 = arith.constant dense<0.000000e+00> : vector<8x8xf32>
    %248 = tpu.matmul %247, %236, %cst_93 {dimension_numbers = #tpu.dot_dimension_numbers<[1], [0], [0], [1], [0, 0, 1, 1], [], []>} : vector<8x16xf32>, vector<16x8xf32>, vector<8x8xf32> -> vector<8x8xf32>
    %249 = vector.extract_strided_slice %169 {offsets = [24, 0], sizes = [8, 32], strides = [1, 1]} : vector<32x32xf32> to vector<8x32xf32>
    %cst_94 = arith.constant dense<0.000000e+00> : vector<8x32xf32>
    %250 = tpu.matmul %248, %249, %cst_94 {dimension_numbers = #tpu.dot_dimension_numbers<[1], [0], [0], [1], [0, 0, 1, 1], [], []>} : vector<8x8xf32>, vector<8x32xf32>, vector<8x32xf32> -> vector<8x32xf32>
    %251 = arith.addf %233, %250 : vector<8x32xf32>
    %252 = vector.broadcast %172 : vector<1x32xf32> to vector<8x32xf32>
    %253 = arith.addf %251, %252 : vector<8x32xf32>
    %254 = arith.addf %130, %253 : vector<8x32xf32>
    %255 = vector.extract_strided_slice %5 {offsets = [4, 0], sizes = [1, 32], strides = [1, 1]} : vector<6x32xf32> to vector<1x32xf32>
    %256 = vector.extract_strided_slice %5 {offsets = [5, 0], sizes = [1, 32], strides = [1, 1]} : vector<6x32xf32> to vector<1x32xf32>
    %257 = vector.extract_strided_slice %6 {offsets = [4, 0], sizes = [1, 32], strides = [1, 1]} : vector<6x32xf32> to vector<1x32xf32>
    %258 = vector.extract_strided_slice %6 {offsets = [5, 0], sizes = [1, 32], strides = [1, 1]} : vector<6x32xf32> to vector<1x32xf32>
    %cst_95 = arith.constant dense<0.000000e+00> : vector<8xf32>
    %259 = vector.multi_reduction <add>, %254, %cst_95 [1] : vector<8x32xf32> to vector<8xf32>
    %260 = vector.shape_cast %259 : vector<8xf32> to vector<8x1xf32>
    %cst_96 = arith.constant 3.200000e+01 : f32
    %261 = vector.broadcast %cst_96 : f32 to vector<8x1xf32>
    %262 = arith.divf %260, %261 : vector<8x1xf32>
    %263 = vector.broadcast %262 : vector<8x1xf32> to vector<8x32xf32>
    %264 = arith.subf %254, %263 : vector<8x32xf32>
    %265 = arith.mulf %264, %264 : vector<8x32xf32>
    %cst_97 = arith.constant dense<0.000000e+00> : vector<8xf32>
    %266 = vector.multi_reduction <add>, %265, %cst_97 [1] : vector<8x32xf32> to vector<8xf32>
    %267 = vector.shape_cast %266 : vector<8xf32> to vector<8x1xf32>
    %cst_98 = arith.constant 3.200000e+01 : f32
    %268 = vector.broadcast %cst_98 : f32 to vector<8x1xf32>
    %269 = arith.divf %267, %268 : vector<8x1xf32>
    %270 = vector.broadcast %262 : vector<8x1xf32> to vector<8x32xf32>
    %271 = arith.subf %254, %270 : vector<8x32xf32>
    %cst_99 = arith.constant 9.99999974E-6 : f32
    %272 = vector.broadcast %cst_99 : f32 to vector<8x1xf32>
    %273 = arith.addf %269, %272 : vector<8x1xf32>
    %274 = math.rsqrt %273 : vector<8x1xf32>
    %275 = vector.broadcast %274 : vector<8x1xf32> to vector<8x32xf32>
    %276 = arith.mulf %271, %275 : vector<8x32xf32>
    %277 = vector.broadcast %257 : vector<1x32xf32> to vector<8x32xf32>
    %278 = arith.mulf %276, %277 : vector<8x32xf32>
    %279 = vector.broadcast %258 : vector<1x32xf32> to vector<8x32xf32>
    %280 = arith.addf %278, %279 : vector<8x32xf32>
    %cst_100 = arith.constant -0.899999976 : f32
    %cst_101 = arith.constant 1.000000e+01 : f32
    %281 = vector.broadcast %cst_100 : f32 to vector<1x32xf32>
    %282 = arith.maximumf %281, %255 : vector<1x32xf32>
    %283 = vector.broadcast %cst_101 : f32 to vector<1x32xf32>
    %284 = arith.minimumf %283, %282 : vector<1x32xf32>
    %cst_102 = arith.constant 1.000000e+00 : f32
    %285 = vector.broadcast %cst_102 : f32 to vector<1x32xf32>
    %286 = arith.addf %285, %284 : vector<1x32xf32>
    %287 = vector.broadcast %286 : vector<1x32xf32> to vector<8x32xf32>
    %288 = arith.mulf %280, %287 : vector<8x32xf32>
    %289 = vector.broadcast %256 : vector<1x32xf32> to vector<8x32xf32>
    %290 = arith.addf %288, %289 : vector<8x32xf32>
    %c0_103 = arith.constant 0 : index
    %c0_104 = arith.constant 0 : index
    %291 = vector.load %arg17[%c0_103, %c0_104] : memref<32x64xf32, #tpu.memory_space<vmem>>, vector<32x64xf32>
    %cst_105 = arith.constant dense<0.000000e+00> : vector<8x64xf32>
    %292 = tpu.matmul %290, %291, %cst_105 {dimension_numbers = #tpu.dot_dimension_numbers<[1], [0], [0], [1], [0, 0, 1, 1], [], []>} : vector<8x32xf32>, vector<32x64xf32>, vector<8x64xf32> -> vector<8x64xf32>
    %c0_106 = arith.constant 0 : index
    %c0_107 = arith.constant 0 : index
    %293 = vector.load %arg18[%c0_106, %c0_107] : memref<1x64xf32, #tpu.memory_space<vmem>>, vector<1x64xf32>
    %294 = vector.broadcast %293 : vector<1x64xf32> to vector<8x64xf32>
    %295 = arith.addf %292, %294 : vector<8x64xf32>
    %cst_108 = arith.constant 5.000000e-01 : f32
    %296 = vector.broadcast %cst_108 : f32 to vector<8x64xf32>
    %297 = arith.mulf %296, %295 : vector<8x64xf32>
    %cst_109 = arith.constant 0.707106769 : f32
    %298 = vector.broadcast %cst_109 : f32 to vector<8x64xf32>
    %299 = arith.mulf %295, %298 : vector<8x64xf32>
    %cst_110 = arith.constant 0.000000e+00 : f32
    %300 = vector.broadcast %cst_110 : f32 to vector<8x64xf32>
    %301 = arith.cmpf oge, %299, %300 : vector<8x64xf32>
    %cst_111 = arith.constant 1.000000e+00 : f32
    %cst_112 = arith.constant -1.000000e+00 : f32
    %302 = vector.broadcast %cst_111 : f32 to vector<8x64xf32>
    %303 = vector.broadcast %cst_112 : f32 to vector<8x64xf32>
    %304 = arith.select %301, %302, %303 : vector<8x64xi1>, vector<8x64xf32>
    %305 = math.absf %299 : vector<8x64xf32>
    %cst_113 = arith.constant 0.327591091 : f32
    %306 = vector.broadcast %cst_113 : f32 to vector<8x64xf32>
    %307 = arith.mulf %306, %305 : vector<8x64xf32>
    %cst_114 = arith.constant 1.000000e+00 : f32
    %308 = vector.broadcast %cst_114 : f32 to vector<8x64xf32>
    %309 = arith.addf %308, %307 : vector<8x64xf32>
    %310 = tpu.reciprocal %309 {approx = true} : vector<8x64xf32> -> vector<8x64xf32>
    %cst_115 = arith.constant 1.06140542 : f32
    %311 = vector.broadcast %cst_115 : f32 to vector<8x64xf32>
    %312 = arith.mulf %311, %310 : vector<8x64xf32>
    %cst_116 = arith.constant -1.45315206 : f32
    %313 = vector.broadcast %cst_116 : f32 to vector<8x64xf32>
    %314 = arith.addf %312, %313 : vector<8x64xf32>
    %315 = arith.mulf %314, %310 : vector<8x64xf32>
    %cst_117 = arith.constant 1.42141378 : f32
    %316 = vector.broadcast %cst_117 : f32 to vector<8x64xf32>
    %317 = arith.addf %315, %316 : vector<8x64xf32>
    %318 = arith.mulf %317, %310 : vector<8x64xf32>
    %cst_118 = arith.constant -0.284496725 : f32
    %319 = vector.broadcast %cst_118 : f32 to vector<8x64xf32>
    %320 = arith.addf %318, %319 : vector<8x64xf32>
    %321 = arith.mulf %320, %310 : vector<8x64xf32>
    %cst_119 = arith.constant 0.254829586 : f32
    %322 = vector.broadcast %cst_119 : f32 to vector<8x64xf32>
    %323 = arith.addf %321, %322 : vector<8x64xf32>
    %324 = arith.mulf %323, %310 : vector<8x64xf32>
    %cst_120 = arith.constant 0.000000e+00 : f32
    %325 = vector.broadcast %cst_120 : f32 to vector<8x64xf32>
    %326 = arith.subf %325, %305 : vector<8x64xf32>
    %327 = arith.mulf %326, %305 : vector<8x64xf32>
    %328 = math.exp %327 : vector<8x64xf32>
    %329 = arith.mulf %324, %328 : vector<8x64xf32>
    %cst_121 = arith.constant 1.000000e+00 : f32
    %330 = vector.broadcast %cst_121 : f32 to vector<8x64xf32>
    %331 = arith.subf %330, %329 : vector<8x64xf32>
    %332 = arith.mulf %304, %331 : vector<8x64xf32>
    %cst_122 = arith.constant 1.000000e+00 : f32
    %333 = vector.broadcast %cst_122 : f32 to vector<8x64xf32>
    %334 = arith.addf %333, %332 : vector<8x64xf32>
    %335 = arith.mulf %297, %334 : vector<8x64xf32>
    %c0_123 = arith.constant 0 : index
    %c0_124 = arith.constant 0 : index
    %336 = vector.load %arg19[%c0_123, %c0_124] : memref<64x32xf32, #tpu.memory_space<vmem>>, vector<64x32xf32>
    %cst_125 = arith.constant dense<0.000000e+00> : vector<8x32xf32>
    %337 = tpu.matmul %335, %336, %cst_125 {dimension_numbers = #tpu.dot_dimension_numbers<[1], [0], [0], [1], [0, 0, 1, 1], [], []>} : vector<8x64xf32>, vector<64x32xf32>, vector<8x32xf32> -> vector<8x32xf32>
    %c0_126 = arith.constant 0 : index
    %c0_127 = arith.constant 0 : index
    %338 = vector.load %arg20[%c0_126, %c0_127] : memref<1x32xf32, #tpu.memory_space<vmem>>, vector<1x32xf32>
    %339 = vector.broadcast %338 : vector<1x32xf32> to vector<8x32xf32>
    %340 = arith.addf %337, %339 : vector<8x32xf32>
    %341 = arith.addf %290, %340 : vector<8x32xf32>
    %c0_128 = arith.constant 0 : index
    %c0_129 = arith.constant 0 : index
    %c0_130 = arith.constant 0 : index
    %342 = vector.load %arg21[%c0_128, %c0_129, %c0_130] : memref<1x8x32xf32, #tpu.memory_space<vmem>>, vector<1x8x32xf32>
    %343 = vector.shape_cast %342 : vector<1x8x32xf32> to vector<8x32xf32>
    %344 = vector.shape_cast %341 : vector<8x32xf32> to vector<1x8x32xf32>
    tpu.vector_store %arg21[%c0_128, %c0_129, %c0_130], %344 {strides = array<i32>} : memref<1x8x32xf32, #tpu.memory_space<vmem>>, vector<1x8x32xf32>,
    return
  }
  func.func @transform_0(%arg0: i32) -> (i32, i32, i32) {
    %c0_i32 = arith.constant 0 : i32
    %c0_i32_0 = arith.constant 0 : i32
    %c0_i32_1 = arith.constant 0 : i32
    return %arg0, %c0_i32, %c0_i32_0 : i32, i32, i32
  }
  func.func @transform_1(%arg0: i32) -> (i32, i32, i32) {
    %c0_i32 = arith.constant 0 : i32
    %c0_i32_0 = arith.constant 0 : i32
    %c0_i32_1 = arith.constant 0 : i32
    return %arg0, %c0_i32, %c0_i32_0 : i32, i32, i32
  }
  func.func @transform_2(%arg0: i32) -> (i32, i32, i32) {
    %c0_i32 = arith.constant 0 : i32
    %c0_i32_0 = arith.constant 0 : i32
    %c0_i32_1 = arith.constant 0 : i32
    return %arg0, %c0_i32, %c0_i32_0 : i32, i32, i32
  }
  func.func @transform_3(%arg0: i32) -> (i32, i32) {
    %c0_i32 = arith.constant 0 : i32
    %c0_i32_0 = arith.constant 0 : i32
    %c0_i32_1 = arith.constant 0 : i32
    return %c0_i32, %c0_i32_0 : i32, i32
  }
  func.func @transform_4(%arg0: i32) -> (i32, i32) {
    %c0_i32 = arith.constant 0 : i32
    %c0_i32_0 = arith.constant 0 : i32
    %c0_i32_1 = arith.constant 0 : i32
    return %c0_i32, %c0_i32_0 : i32, i32
  }
  func.func @transform_5(%arg0: i32) -> (i32, i32) {
    %c0_i32 = arith.constant 0 : i32
    %c0_i32_0 = arith.constant 0 : i32
    %c0_i32_1 = arith.constant 0 : i32
    return %c0_i32, %c0_i32_0 : i32, i32
  }
  func.func @transform_6(%arg0: i32) -> (i32, i32) {
    %c0_i32 = arith.constant 0 : i32
    %c0_i32_0 = arith.constant 0 : i32
    %c0_i32_1 = arith.constant 0 : i32
    return %c0_i32, %c0_i32_0 : i32, i32
  }
  func.func @transform_7(%arg0: i32) -> (i32, i32) {
    %c0_i32 = arith.constant 0 : i32
    %c0_i32_0 = arith.constant 0 : i32
    %c0_i32_1 = arith.constant 0 : i32
    return %c0_i32, %c0_i32_0 : i32, i32
  }
  func.func @transform_8(%arg0: i32) -> (i32, i32) {
    %c0_i32 = arith.constant 0 : i32
    %c0_i32_0 = arith.constant 0 : i32
    %c0_i32_1 = arith.constant 0 : i32
    return %c0_i32, %c0_i32_0 : i32, i32
  }
  func.func @transform_9(%arg0: i32) -> (i32, i32) {
    %c0_i32 = arith.constant 0 : i32
    %c0_i32_0 = arith.constant 0 : i32
    %c0_i32_1 = arith.constant 0 : i32
    return %c0_i32, %c0_i32_0 : i32, i32
  }
  func.func @transform_10(%arg0: i32) -> (i32, i32) {
    %c0_i32 = arith.constant 0 : i32
    %c0_i32_0 = arith.constant 0 : i32
    %c0_i32_1 = arith.constant 0 : i32
    return %c0_i32, %c0_i32_0 : i32, i32
  }
  func.func @transform_11(%arg0: i32) -> (i32, i32) {
    %c0_i32 = arith.constant 0 : i32
    %c0_i32_0 = arith.constant 0 : i32
    %c0_i32_1 = arith.constant 0 : i32
    return %c0_i32, %c0_i32_0 : i32, i32
  }
  func.func @transform_12(%arg0: i32) -> (i32, i32) {
    %c0_i32 = arith.constant 0 : i32
    %c0_i32_0 = arith.constant 0 : i32
    %c0_i32_1 = arith.constant 0 : i32
    return %c0_i32, %c0_i32_0 : i32, i32
  }
  func.func @transform_13(%arg0: i32) -> (i32, i32) {
    %c0_i32 = arith.constant 0 : i32
    %c0_i32_0 = arith.constant 0 : i32
    %c0_i32_1 = arith.constant 0 : i32
    return %c0_i32, %c0_i32_0 : i32, i32
  }
  func.func @transform_14(%arg0: i32) -> (i32, i32) {
    %c0_i32 = arith.constant 0 : i32
    %c0_i32_0 = arith.constant 0 : i32
    %c0_i32_1 = arith.constant 0 : i32
    return %c0_i32, %c0_i32_0 : i32, i32
  }
  func.func @transform_15(%arg0: i32) -> (i32, i32) {
    %c0_i32 = arith.constant 0 : i32
    %c0_i32_0 = arith.constant 0 : i32
    %c0_i32_1 = arith.constant 0 : i32
    return %c0_i32, %c0_i32_0 : i32, i32
  }
  func.func @transform_16(%arg0: i32) -> (i32, i32) {
    %c0_i32 = arith.constant 0 : i32
    %c0_i32_0 = arith.constant 0 : i32
    %c0_i32_1 = arith.constant 0 : i32
    return %c0_i32, %c0_i32_0 : i32, i32
  }
  func.func @transform_17(%arg0: i32) -> (i32, i32) {
    %c0_i32 = arith.constant 0 : i32
    %c0_i32_0 = arith.constant 0 : i32
    %c0_i32_1 = arith.constant 0 : i32
    return %c0_i32, %c0_i32_0 : i32, i32
  }
  func.func @transform_18(%arg0: i32) -> (i32, i32) {
    %c0_i32 = arith.constant 0 : i32
    %c0_i32_0 = arith.constant 0 : i32
    %c0_i32_1 = arith.constant 0 : i32
    return %c0_i32, %c0_i32_0 : i32, i32
  }
  func.func @transform_19(%arg0: i32) -> (i32, i32) {
    %c0_i32 = arith.constant 0 : i32
    %c0_i32_0 = arith.constant 0 : i32
    %c0_i32_1 = arith.constant 0 : i32
    return %c0_i32, %c0_i32_0 : i32, i32
  }
  func.func @transform_20(%arg0: i32) -> (i32, i32, i32) {
    %c0_i32 = arith.constant 0 : i32
    %c0_i32_0 = arith.constant 0 : i32
    %c0_i32_1 = arith.constant 0 : i32
    return %arg0, %c0_i32, %c0_i32_0 : i32, i32, i32
  }
}

</mosaic_0001>

<bundles_post_ra>
// kernel: decoder_block_forward.1
= control target key start
LH: loop header
LB: loop body
LE: loop exit
PB: predicated region body
PF: predicated region fallthrough
CT: control target
= control target key end

     0   :  { %s3242_s0 = inlined_call_operand.vmem [shape: f32[2,8,32], index: 0, kind: input, shape index: {}]   ;;  %s3243_s1 = inlined_call_operand.vmem [shape: f32[2,16,32], index: 1, kind: input, shape index: {}]   ;;  %s3244_s2 = inlined_call_operand.vmem [shape: f32[2,6,32], index: 2, kind: input, shape index: {}]   ;;  %s3245_s3 = inlined_call_operand.vmem [shape: f32[6,32], index: 3, kind: input, shape index: {}]   ;;  %s3246_s4 = inlined_call_operand.vmem [shape: f32[32,32], index: 4, kind: input, shape index: {}]   ;;  %s3247_s5 = inlined_call_operand.vmem [shape: f32[32,64], index: 5, kind: input, shape index: {}]   ;;  %s3248_s6 = inlined_call_operand.hbm [shape: f32[32,32], index: 6, kind: input, shape index: {}]   ;;  %s3249_s7 = inlined_call_operand.vmem [shape: f32[1,32], index: 7, kind: input, shape index: {}]   ;;  %s3250_s8 = inlined_call_operand.vmem [shape: f32[1,64], index: 8, kind: input, shape index: {}]   ;;  %s3251_s9 = inlined_call_operand.vmem [shape: f32[1,32], index: 9, kind: input, shape index: {}]   ;;  %s3252_s10 = inlined_call_operand.hbm [shape: f32[32,32], index: 10, kind: input, shape index: {}]   ;;  %s3253_s11 = inlined_call_operand.hbm [shape: f32[32,64], index: 11, kind: input, shape index: {}]   ;;  %s3254_s12 = inlined_call_operand.hbm [shape: f32[32,32], index: 12, kind: input, shape index: {}]   ;;  %s3255_s13 = inlined_call_operand.vmem [shape: f32[1,32], index: 13, kind: input, shape index: {}]   ;;  %s3256_s14 = inlined_call_operand.hbm [shape: f32[1,64], index: 14, kind: input, shape index: {}]   ;;  %s3257_s15 = inlined_call_operand.hbm [shape: f32[1,32], index: 15, kind: input, shape index: {}]   ;;  %s3258_s16 = inlined_call_operand.hbm [shape: f32[32,64], index: 16, kind: input, shape index: {}]   ;;  %s3259_s17 = inlined_call_operand.hbm [shape: f32[1,64], index: 17, kind: input, shape index: {}]   ;;  %s3260_s18 = inlined_call_operand.vmem [shape: f32[64,32], index: 18, kind: input, shape index: {}]   ;;  %s3261_s19 = inlined_call_operand.hbm [shape: f32[1,32], index: 19, kind: input, shape index: {}]   ;;  %s3262_s20 = inlined_call_operand.hbm [shape: f32[2,8,32], index: 20, kind: output, shape index: {}]  }
   0x1   :  { %3273 = sst [smem:[#allocation31_spill]] %s3242_s0 }
   0x2   :  { %3274 = sst [smem:[#allocation32_spill]] %s3243_s1 }
   0x3   :  { %3275 = sst [smem:[#allocation33_spill]] %s3244_s2 }
   0x4   :  { %3276 = sst [smem:[#allocation34_spill]] %s3245_s3 }
   0x5   :  { %3277 = sst [smem:[#allocation35_spill]] %s3246_s4 }
   0x6   :  { %3278 = sst [smem:[#allocation36_spill]] %s3252_s10 }
   0x7   :  { %3279 = sst [smem:[#allocation37_spill]] %s3254_s12 }
   0x8   :  { %3280 = sst [smem:[#allocation38_spill]] %s3257_s15 }
   0x9   :  { %3281 = sst [smem:[#allocation39_spill]] %s3262_s20 }
   0xa   :  { %25 = vsyncpa [#allocation3], 0 }
   0xb   :  { %26 = vsyncpa [#allocation6], 0 }
   0xc   :  { %27 = vsyncpa [#allocation9], 0 }
   0xd   :  { %28 = vsyncpa [#allocation12], 0 }
   0xe   :  { %29 = vsyncpa [#allocation15], 0 }
   0xf   :  { %30 = vsyncpa [#allocation4], 0 }
  0x10   :  { %32 = vsyncpa [#allocation4 + $0x1], 0  ;;  %s2838_s1 = smov 0   ;;  %s2840_s22 = smov 0  }
  0x11   :  { %s2842_s23 = smov 0   ;;  %s2844_s24 = smov 0  }
  0x12 LB: > { %3282 = sst [smem:[#allocation24_spill]] %s2699_s1  ;;  %s2859_s2 = sadd.s32 4294967295, %s2711_s24   ;;  %s2711_s24 = sphi %s2844_s24, %s3306_s24   ;;  %s2707_s23 = sphi %s2842_s23, %s3308_s23   ;;  %s2703_s22 = sphi %s2840_s22, %s3310_s22   ;;  %s2699_s1 = sphi %s2838_s1, %s3309_s1  }
  0x13   : > { %3283 = sst [smem:[#allocation25_spill]] %s2707_s23  ;;  %s2071_s25 = sadd.s32 4294967294, %s2711_s24  }
  0x14   : > { %3284 = sst [smem:[#allocation26_spill]] %s2711_s24  ;;  %s2863_s3 = sadd.s32 1, %s2711_s24  }
  0x15   : > { %3285 = sst [smem:[#allocation27_spill]] %s2863_s3  ;;  %s480_s26 = sadd.s32 1, %s2707_s23 }
  0x16   : > { %s477_s27 = ssub.s32 %s2711_s24, %s2863_s3  ;;  %p490_p0 = scmp.ne.s32.totalorder %s2707_s23, %s2703_s22 }
  0x17   : > { %p478_p1 = scmp.eq.s32.totalorder %s477_s27, 0  ;;  %p491_p2 = scmp.eq.s32.totalorder %s2859_s2, 1 }
  0x18   : > { %p496_p3 = scmp.ne.s32.totalorder %s2703_s22, %s2699_s1  ;;  %p497_p4 = scmp.eq.s32.totalorder %s2071_s25, 1 }
  0x19   : > { %s2874_s28 = scalar_select %p478_p1, %s2707_s23, %s480_s26  }
  0x1a   : > { %p2876_p5 = por %p491_p2, %p490_p0  ;;  %p2880_p6 = por %p497_p4, %p496_p3 }
  0x1b   : > { %3286 = sst [smem:[#allocation28_spill]] %s2874_s28  ;;  %p2072_p7 = scmp.ge.s32.totalorder %s2711_s24, 1 }
  0x1c   : > { %s3287_s4 = scalar_select %p2876_p5, 1, 0 }
  0x1d   : > { %s3289_s29 = scalar_select %p2880_p6, 1, 0 }
  0x1e   : > { %3288 = sst [smem:[#allocation29_spill]] %s3287_s4  ;;  %p504_p8 = scmp.lt.s32.totalorder %s2711_s24, 3 }
  0x1f   : > { %3290 = sst [smem:[#allocation30_spill]] %s3289_s29  ;;  %p2216_p9 = scmp.eq.s32.totalorder %s2859_s2, 0 }
  0x20   : > { %p2887_p10 = pnand %p2072_p7, %p504_p8  ;;  %s3292_s10 = sld [smem:[#allocation36_spill]] }
  0x21   : > { %s3293_s12 = sld [smem:[#allocation37_spill]]  ;;  %s2713_s3 = smov [#allocation5]  }
  0x22   : > { %p2184_p11 = pneg %p2887_p10  ;;  %s549_s29 = sshll.u32 %s2713_s3, 4  ;;  %s550_s29 = int_to_ptr.vmem [resolvable:$true] %s549_s29 }
  0x23   : > { %s2714_s0 = smov 128   ;;  %s2715_s21 = smov 8  }
  0x24   : > { %p2901_p12 = pnand %p2216_p9, %p2184_p11  ;;  %s2716_s26 = smov [#allocation8]  }
  0x25   : > { %s577_s27 = sshll.u32 %s2716_s26, 4  ;;  %s3295_s15 = sld [smem:[#allocation38_spill]]  ;;  %s578_s27 = int_to_ptr.vmem [resolvable:$true] %s577_s27 }
  0x26   : > { %s547_s25 = sshll.u32 %s3292_s10, 4  ;;  %s631_s4 = sshll.u32 %s3259_s17, 4  ;;  %s548_s25 = int_to_ptr.hbm [resolvable:$true] %s547_s25  ;;  %s632_s4 = int_to_ptr.hbm [resolvable:$true] %s631_s4 }
  0x27   : > { %s575_s28 = sshll.u32 %s3293_s12, 4  ;;  %s2717_s20 = smov [#allocation11]   ;;  %s576_s28 = int_to_ptr.hbm [resolvable:$true] %s575_s28 }
  0x28   : > { %2190 = dma.hbm_to_vmem [thread:$0]  (!%p2901_p12), %s548_s25, 512, %s550_s29, [#allocation6], %s2714_s0, %s2714_s0, %s2715_s21  }
  0x29   : > { %2196 = dma.hbm_to_vmem [thread:$0]  (!%p2901_p12), %s576_s28, 512, %s578_s27, [#allocation9], %s2714_s0, %s2714_s0, %s2715_s21  }
  0x2a   : > { %s607_s29 = sshll.u32 %s2717_s20, 4  ;;  %s2718_s10 = smov [#allocation14]   ;;  %s608_s29 = int_to_ptr.vmem [resolvable:$true] %s607_s29 }
  0x2b   : > { %s605_s1 = sshll.u32 %s3295_s15, 4  ;;  %s633_s12 = sshll.u32 %s2718_s10, 4  ;;  %s606_s1 = int_to_ptr.hbm [resolvable:$true] %s605_s1  ;;  %s634_s12 = int_to_ptr.vmem [resolvable:$true] %s633_s12 }
  0x2c   : > { %2202 = dma.hbm_to_vmem [thread:$0]  (!%p2901_p12), %s606_s1, 16, %s608_s29, [#allocation12]  }
  0x2d   : > { %s524_s15 = sshll.u32 %s3248_s6, 4  ;;  %s561_s27 = sshll.u32 %s3253_s11, 4  ;;  %s525_s15 = int_to_ptr.hbm [resolvable:$true] %s524_s15  ;;  %s562_s27 = int_to_ptr.hbm [resolvable:$true] %s561_s27 }
  0x2e   : > { %2208 = dma.hbm_to_vmem [thread:$0]  (!%p2901_p12), %s632_s4, 16, %s634_s12, [#allocation15]  }
  0x2f   : > { %s2719_s20 = smov [#allocation2]   ;;  %s2720_s1 = smov [#allocation7]  }
  0x30   : > { %s526_s3 = sshll.u32 %s2719_s20, 4  ;;  %s563_s29 = sshll.u32 %s2720_s1, 4  ;;  %s527_s3 = int_to_ptr.vmem [resolvable:$true] %s526_s3  ;;  %s564_s29 = int_to_ptr.vmem [resolvable:$true] %s563_s29 }
  0x31   : > { %2187 = dma.hbm_to_vmem [thread:$0]  (!%p2901_p12), %s525_s15, 512, %s527_s3, [#allocation3], %s2714_s0, %s2714_s0, %s2715_s21  }
  0x32   : > { %s593_s4 = sshll.u32 %s3256_s14, 4  ;;  %s616_s24 = sshll.u32 %s3258_s16, 4  ;;  %s594_s4 = int_to_ptr.hbm [resolvable:$true] %s593_s4  ;;  %s617_s24 = int_to_ptr.hbm [resolvable:$true] %s616_s24 }
  0x33   : > { %2193 = dma.hbm_to_vmem [thread:$0]  (!%p2901_p12), %s562_s27, 512, %s564_s29, [#allocation6], %s2714_s0, %s2714_s0, %s2715_s21  }
  0x34   : > { %s2721_s15 = smov [#allocation10]   ;;  %s2722_s20 = smov [#allocation13]  }
  0x35   : > { %s595_s28 = sshll.u32 %s2721_s15, 4  ;;  %s618_s3 = sshll.u32 %s2722_s20, 4  ;;  %s596_s28 = int_to_ptr.vmem [resolvable:$true] %s595_s28  ;;  %s619_s3 = int_to_ptr.vmem [resolvable:$true] %s618_s3 }
  0x36   : > { %2199 = dma.hbm_to_vmem [thread:$0]  (!%p2901_p12), %s594_s4, 16, %s596_s28, [#allocation9]  }
  0x37   : > { %s646_s25 = sshll.u32 %s3261_s19, 4  ;;  %s2723_s27 = smov [#allocation16]   ;;  %s647_s25 = int_to_ptr.hbm [resolvable:$true] %s646_s25 }
  0x38   : > { %2205 = dma.hbm_to_vmem [thread:$0]  (!%p2901_p12), %s617_s24, 512, %s619_s3, [#allocation12], %s2714_s0, %s2714_s0, %s2715_s21  }
  0x39   : > { %s648_s29 = sshll.u32 %s2723_s27, 4  ;;  %683 = sbr.rel (%p2887_p10) target bundleno = 3833 (0xef9), region = 100  ;;  %s649_s29 = int_to_ptr.vmem [resolvable:$true] %s648_s29 }
  0x3a   : > { %2211 = dma.hbm_to_vmem [thread:$0]  (!%p2901_p12), %s647_s25, 16, %s649_s29, [#allocation15]  }
  0x3e   : > { %2674 = dma.done.wait (%p2216_p9), [#allocation3], 512  }
  0x3f   : > { %2676 = vsyncadd (%p2216_p9), [#allocation3], 4294966784 }
  0x40   : > { %2678 = dma.done.wait (%p2216_p9), [#allocation6], 1024  }
  0x41   : > { %2680 = vsyncadd (%p2216_p9), [#allocation6], 4294966272 }
  0x42   : > { %2682 = dma.done.wait (%p2216_p9), [#allocation9], 528  }
  0x43   : > { %2684 = vsyncadd (%p2216_p9), [#allocation9], 4294966768 }
  0x44   : > { %2686 = dma.done.wait (%p2216_p9), [#allocation12], 528  }
  0x45   : > { %2688 = vsyncadd (%p2216_p9), [#allocation12], 4294966768 }
  0x46   : > { %2690 = dma.done.wait (%p2216_p9), [#allocation15], 32  }
  0x47   : > { %2692 = vsyncadd (%p2216_p9), [#allocation15], 4294967264  ;;  %p790_p13 = scmp.lt.s32.totalorder %s2859_s2, 1  ;;  %s3296_s4 = sld [smem:[#allocation31_spill]]  ;;  %vm808_vm0 = vcmask 261120   ;;  %v2724_v2 = vmov 32.0  }
  0x48   : > { %2315 = vrcp.f32 %v2724_v2  ;;  %s3297_s15 = sld [smem:[#allocation35_spill]]  ;;  %v856_v20 = vld [vmem:[%s3247_s5 + $0x18] sm:$0xff]  ;;  %v855_v21 = vld [vmem:[%s3247_s5 + $0x10] sm:$0xff]  ;;  %v854_v23 = vld [vmem:[%s3247_s5 + $0x8] sm:$0xff]  ;;  %s2725_s0 = smov 120   ;;  %vm913_vm5 = vcmask 64512  }
  0x49   : > { %s2983_s23 = scalar_select %p790_p13, %s2859_s2, 1  ;;  %v853_v24 = vld [vmem:[%s3247_s5] sm:$0xff]  ;;  %vm1403_vm9 = vcmask 130048   ;;  %vm1858_vm14 = vcmask 523264  }
  0x4a   : > { %s3298_s3 = sld [smem:[#allocation33_spill]]  ;;  %v2307_v46 = vld [vmem:[%s3249_s7] ss:$0 sm:$0xff]  ;;  %s2727_s26 = smov 104  }
  0x4b   : > { %s2094_s30 = sshll.u32 %s2983_s23, 3  ;;  %s3299_s27 = sld [smem:[#allocation34_spill]]  ;;  %v2308_v49 = vld [vmem:[%s3250_s8] ss:$0 sm:$0xff] }
  0x4c   : > { %s2728_s24 = smov 112   ;;  %v857_v52 = vld [vmem:[#allocation2] sm:$0xff]  ;;  %s2729_s28 = smov 88  }
  0x4d   : > { %s793_s12 = scalar_lea.vmem %s3296_s4, %s2094_s30  ;;  %s2730_s20 = smov 80  }
  0x4e   : > { %v2991_v0 = vld [vmem:[%s793_s12] sm:$0xff]  ;;  %v2316_v3 = vpop.eup %2315  ;;  %v852_v14 = vld [vmem:[%s3297_s15 + $0x18] sm:$0xff]  ;;  %v851_v15 = vld [vmem:[%s3297_s15 + $0x10] sm:$0xff]  ;;  %s2726_s12 = smov 96   ;;  %s2145_s25 = sshll.u32 %s2983_s23, 4 }
  0x4f   : > { %v809_v1 = vsel %vm808_vm0, %v2991_v0, 0.0  ;;  %v813_v4 = vmul.f32 32.0, %v2316_v3  ;;  %vm817_vm1 = vweird.f32 %v2316_v3  ;;  %882 = vmatpush.msra.mxu1 %v852_v14  ;;  %v850_v16 = vld [vmem:[%s3297_s15 + $0x8] sm:$0xff]  ;;  %v849_v17 = vld [vmem:[%s3297_s15] sm:$0xff]  ;;  %s3300_s29 = sld [smem:[#allocation32_spill]] }
  0x50   : > { %810 = vadd.xlane.f32.xlu0 %v809_v1  ;;  %s802_s1 = scalar_lea.vmem %s3298_s3, %s2094_s30  ;;  %s2731_s3 = smov 72  }
  0x51   : > { %v814_v5 = vsub.f32 1.0, %v813_v4  ;;  %883 = vmatpush.msra.mxu1 %v851_v15  ;;  %v3030_v25 = vld [vmem:[%s802_s1] sm:$0x3f] }
  0x52   : > { %v842_v28 = vmax.f32 %v3030_v25, -0.9  ;;  %v3036_v33 = vld [vmem:[%s3299_s27] sm:$0x3f]  ;;  %v847_v43 = vperm.slane %v3030_v25, 1 }
  0x53   : > { %v815_v6 = vmul.f32 %v2316_v3, %v814_v5  ;;  %884 = vmatpush.msra.mxu1 %v850_v16  ;;  %v838_v36 = vperm.slane %v3036_v33, 0  ;;  %v840_v39 = vperm.slane %v3036_v33, 1 }
  0x54   : > { %v843_v31 = vmin.f32 %v842_v28, 10.0 }
  0x55   : > { %v816_v7 = vadd.f32 %v2316_v3, %v815_v6  ;;  %885 = vmatpush.msra.mxu1 %v849_v17  ;;  %s798_s21 = scalar_lea.vmem %s3300_s29, %s2145_s25 }
  0x56   : > { %v3038_v35 = vadd.f32 1.0, %v843_v31 }
  0x57   : > { %v2995_v8 = vsel %vm817_vm1, %v2316_v3, %v816_v7  ;;  %905 = vmatpush.msrb.mxu1 %v856_v20 }
  0x58   : > { %v845_v41 = vperm.slane %v3038_v35, 0 }
  0x59   : > { %906 = vmatpush.msrb.mxu1 %v855_v21 }
  0x5b   : > { %907 = vmatpush.msrb.mxu1 %v854_v23 }
  0x5d   : > { %908 = vmatpush.msrb.mxu1 %v853_v24 }
  0xc3   : > { %v811_v9 = vpop.xlane.xlu0 %810 }
  0xc4   : > { %v819_v10 = vmul.f32 %v2995_v8, %v811_v9 }
  0xc6   : > { %v820_v11 = vsub.f32 %v2991_v0, %v819_v10 }
  0xc8   : > { %v821_v12 = vmul.f32 %v820_v11, %v820_v11 }
  0xca   : > { %v822_v13 = vsel %vm808_vm0, %v821_v12, 0.0 }
  0xcb   : > { %823 = vadd.xlane.f32.xlu0 %v822_v13 }
 0x13e   : > { %v824_v18 = vpop.xlane.xlu0 %823 }
 0x13f   : > { %v825_v19 = vmul.f32 %v824_v18, %v2995_v8 }
 0x141   : > { %v826_v22 = vadd.f32 1e-05, %v825_v19 }
 0x143   : > { %2317 = vrsqrt.f32 %v826_v22  ;;  %vm833_vm3 = vweird.f32 %v826_v22 }
 0x149   : > { %v2318_v26 = vpop.eup %2317 }
 0x14a   : > { %v828_v27 = vmul.f32 %v2318_v26, %v826_v22  ;;  %vm834_vm2 = vweird.f32 %v2318_v26 }
 0x14b   : > { %vm835_vm4 = vmor %vm833_vm3, %vm834_vm2 }
 0x14c   : > { %v829_v29 = vmul.f32 %v2318_v26, %v828_v27 }
 0x14e   : > { %v830_v30 = vmul.f32 0.5, %v829_v29 }
 0x150   : > { %v831_v32 = vsub.f32 1.5, %v830_v30 }
 0x152   : > { %v832_v34 = vmul.f32 %v2318_v26, %v831_v32 }
 0x154   : > { %v836_v37 = vsel %vm835_vm4, %v2318_v26, %v832_v34 }
 0x155   : > { %v837_v38 = vmul.f32 %v836_v37, %v820_v11 }
 0x157   : > { %v839_v40 = vmul.f32 %v838_v36, %v837_v38 }
 0x159   : > { %v841_v42 = vadd.f32 %v840_v39, %v839_v40 }
 0x15b   : > { %v846_v44 = vmul.f32 %v845_v41, %v841_v42  ;;  %v858_v42 = vld [vmem:[#allocation2 + $0x8] sm:$0xff] }
 0x15c   : > { %1060 = vmatpush.msra.mxu0 %v858_v42  ;;  %v2311_v42 = vld [vmem:[%s3255_s13] ss:$0 sm:$0xff] }
 0x15d   : > { %v848_v45 = vadd.f32 %v847_v43, %v846_v44 }
 0x15f   : > { %2098 = vmatmul.msk.f32.vlgmr.msra.gmra.mxu1 %vm808_vm0, %v848_v45 }
 0x160   : > { %1083 = vmatpush.msra.mxu1 %v857_v52 }
 0x167   : > { %2099 = vmatmul.msk.f32.vlgmr.msrb.gmra.mxu1 %vm808_vm0, %v848_v45 }
 0x1dc   : > { %v887_v47 = vpop.f32.mrf.mxu1 }
 0x1dd   : > { %v888_v48 = vadd.f32 %v2307_v46, %v887_v47  ;;  %v859_v47 = vld [vmem:[#allocation2 + $0x10] sm:$0xff] }
 0x1de   : > { %1171 = vmatpush.msrb.mxu0 %v859_v47 }
 0x1df   : > { %977 = vrot.lane.b32.xlu0 %v888_v48, %s2725_s0 }
 0x1e4   : > { %v910_v50 = vpop.f32.mrf.mxu1 }
 0x1e5   : > { %v3053_v51 = vadd.f32 %v2308_v49, %v910_v50  ;;  %v860_v50 = vld [vmem:[#allocation2 + $0x18] sm:$0xff] }
 0x1e7   : > { %951 = vrot.lane.b32.xlu2 %v3053_v51, %s2726_s12  ;;  %2100 = vmatpush.xpose.msk.msra.mxu2 %vm913_vm5, %v3053_v51 }
 0x1ea   : > { %2101 = vmatmul.msk.f32.vlgmr.msra.gmra.mxu2 %vm913_vm5, %v888_v48 }
 0x1ef   : > { %979 = vrot.lane.b32.xlu2 %v3053_v51, %s2725_s0 }
 0x1f7   : > { %1179 = vrot.lane.b32.xlu2 %v3053_v51, %s2727_s26 }
 0x1ff   : > { %1088 = vrot.lane.b32.xlu2 %v888_v48, %s2728_s24 }
 0x207   : > { %1177 = vrot.lane.b32.xlu2 %v888_v48, %s2727_s26 }
 0x241   : > { %v952_v53 = vpop.permute.xlu2 %951 }
 0x242   : > { %972 = vmatpush.msra.mxu3 %v952_v53 }
 0x249   : > { %v980_v54 = vpop.permute.xlu2 %979 }
 0x24a   : > { %2103 = vmatpush.xpose.msk.msrb.mxu3 %vm913_vm5, %v980_v54 }
 0x251   : > { %v1180_v55 = vpop.permute.xlu2 %1179  ;;  %v978_v3 = vpop.permute.xlu0 %977 }
 0x252   : > { %2112 = vmatpush.xpose.msk.msrb.mxu1 %vm913_vm5, %v1180_v55 }
 0x259   : > { %v1089_v5 = vpop.permute.xlu2 %1088 }
 0x261   : > { %v1178_v7 = vpop.permute.xlu2 %1177 }
 0x26d   : > { %v937_v56 = vpop.f32.mrf.mxu2 }
 0x26e   : > { %v940_v57 = vsel %vm913_vm5, %v937_v56, -inf }
 0x26f   : > { %941 = vmax.xlane.f32.xlu1 %v940_v57 }
 0x2e2   : > { %v942_v58 = vpop.xlane.xlu1 %941 }
 0x2e3   : > { %v943_v59 = vsub.f32 %v937_v56, %v942_v58  ;;  %v2309_v56 = vld [vmem:[%s3251_s9] ss:$0 sm:$0xff] }
 0x2e5   : > { %v944_v60 = vmul.f32 1.442695, %v943_v59 }
 0x2e7   : > { %2319 = vpow2.f32 %v944_v60 }
 0x2ed   : > { %v2320_v61 = vpop.eup %2319 }
 0x2ee   : > { %v946_v62 = vsel %vm913_vm5, %v2320_v61, 0.0 }
 0x2ef   : > { %947 = vadd.xlane.f32.xlu1 %v946_v62  ;;  %v1308_v62 = vld [vmem:[#allocation7 + $0x18] sm:$0xff] }
 0x308   : > { %1090 = vrot.lane.b32.xlu1 %v3053_v51, %s2728_s24 }
 0x362   : > { %v948_v63 = vpop.xlane.xlu1 %947 }
 0x363   : > { %2321 = vrcp.f32 %v948_v63  ;;  %v1307_v63 = vld [vmem:[#allocation7 + $0x10] sm:$0xff] }
 0x369   : > { %v2322_v1 = vpop.eup %2321 }
 0x36a   : > { %v950_v2 = vmul.f32 %v2322_v1, %v2320_v61  ;;  %v1306_v1 = vld [vmem:[#allocation7 + $0x8] sm:$0xff] }
 0x36c   : > { %2102 = vmatmul.msk.f32.vlgmr.msra.gmra.mxu3 %vm913_vm5, %v950_v2 }
 0x374   : > { %2104 = vmatmul.msk.f32.vlgmr.msrb.gmra.mxu3 %vm913_vm5, %v978_v3 }
 0x37a   : > { %v1091_v4 = vpop.permute.xlu1 %1090 }
 0x37b   : > { %2108 = vmatpush.xpose.msk.msra.mxu3 %vm913_vm5, %v1091_v4 }
 0x37e   : > { %2109 = vmatmul.msk.f32.vlgmr.msra.gmra.mxu3 %vm913_vm5, %v1089_v5 }
 0x3ef   : > { %v974_v6 = vpop.f32.mrf.mxu3 }
 0x3f0   : > { %2107 = vmatmul.msk.f32.vlgmr.msra.gmra.mxu1 %vm913_vm5, %v974_v6 }
 0x3f1   : > { %1363 = vmatpush.msra.mxu1 %v1308_v62 }
 0x3f3   : > { %1364 = vmatpush.msra.mxu1 %v1307_v63  ;;  %v1309_v63 = vld [vmem:[#allocation8] sm:$0xff] }
 0x3f5   : > { %1365 = vmatpush.msra.mxu1 %v1306_v1 }
 0x3f7   : > { %v1002_v9 = vpop.f32.mrf.mxu3 }
 0x3f8   : > { %2113 = vmatmul.msk.f32.vlgmr.msrb.gmra.mxu1 %vm913_vm5, %v1178_v7  ;;  %v1005_v10 = vsel %vm913_vm5, %v1002_v9, -inf  ;;  %v804_v7 = vld [vmem:[%s798_s21] sm:$0xff] }
 0x3f9   : > { %1006 = vmax.xlane.f32.xlu0 %v1005_v10  ;;  %v1304_v10 = vld [vmem:[#allocation5 + $0x18] sm:$0xff] }
 0x401   : > { %v1113_v11 = vpop.f32.mrf.mxu3 }
 0x402   : > { %v1116_v12 = vsel %vm913_vm5, %v1113_v11, -inf }
 0x403   : > { %1117 = vmax.xlane.f32.xlu1 %v1116_v12  ;;  %v1302_v12 = vld [vmem:[#allocation5 + $0x8] sm:$0xff] }
 0x46c   : > { %v1007_v13 = vpop.xlane.xlu0 %1006 }
 0x46d   : > { %v1008_v14 = vsub.f32 %v1002_v9, %v1007_v13  ;;  %v3080_v15 = vpop.f32.mrf.mxu1  ;;  %v805_v9 = vld [vmem:[%s798_s21 + $0x8] sm:$0xff]  ;;  %v1301_v13 = vld [vmem:[#allocation5] sm:$0xff] }
 0x46f   : > { %v1009_v16 = vmul.f32 1.442695, %v1008_v14 }
 0x471   : > { %2323 = vpow2.f32 %v1009_v16 }
 0x475   : > { %v1202_v17 = vpop.f32.mrf.mxu1 }
 0x476   : > { %v1118_v18 = vpop.xlane.xlu1 %1117  ;;  %v1205_v19 = vsel %vm913_vm5, %v1202_v17, -inf }
 0x477   : > { %v2324_v20 = vpop.eup %2323  ;;  %v1119_v21 = vsub.f32 %v1113_v11, %v1118_v18  ;;  %1206 = vmax.xlane.f32.xlu2 %v1205_v19  ;;  %v1303_v11 = vld [vmem:[#allocation5 + $0x10] sm:$0xff] }
 0x478   : > { %v1011_v22 = vsel %vm913_vm5, %v2324_v20, 0.0 }
 0x479   : > { %v1120_v23 = vmul.f32 1.442695, %v1119_v21  ;;  %1012 = vadd.xlane.f32.xlu0 %v1011_v22 }
 0x47b   : > { %2325 = vpow2.f32 %v1120_v23  ;;  %v1293_v23 = vperm.slane %v3036_v33, 2 }
 0x481   : > { %v2326_v24 = vpop.eup %2325 }
 0x482   : > { %v1122_v26 = vsel %vm913_vm5, %v2326_v24, 0.0 }
 0x483   : > { %1123 = vadd.xlane.f32.xlu1 %v1122_v26  ;;  %v1295_v26 = vperm.slane %v3036_v33, 3 }
 0x48d   : > { %1016 = vrot.lane.b32.xlu0 %v3053_v51, %s2729_s28 }
 0x49c   : > { %1127 = vrot.lane.b32.xlu1 %v3053_v51, %s2730_s20 }
 0x4ea   : > { %v1207_v27 = vpop.xlane.xlu2 %1206 }
 0x4eb   : > { %v1208_v28 = vsub.f32 %v1202_v17, %v1207_v27 }
 0x4ec   : > { %v1013_v30 = vpop.xlane.xlu0 %1012 }
 0x4ed   : > { %v1209_v29 = vmul.f32 1.442695, %v1208_v28  ;;  %v1297_v28 = vperm.slane %v3038_v35, 2 }
 0x4ef   : > { %2327 = vpow2.f32 %v1209_v29 }
 0x4f0   : > { %2329 = vrcp.f32 %v1013_v30  ;;  %v1299_v30 = vperm.slane %v3030_v25, 3 }
 0x4f5   : > { %v2328_v31 = vpop.eup %2327 }
 0x4f6   : > { %v1211_v32 = vsel %vm913_vm5, %v2328_v31, 0.0  ;;  %v2330_v34 = vpop.eup %2329  ;;  %v1124_v38 = vpop.xlane.xlu1 %1123 }
 0x4f7   : > { %1212 = vadd.xlane.f32.xlu2 %v1211_v32  ;;  %v1015_v37 = vmul.f32 %v2330_v34, %v2324_v20  ;;  %2331 = vrcp.f32 %v1124_v38 }
 0x4fd   : > { %v2332_v39 = vpop.eup %2331 }
 0x4fe   : > { %v1126_v40 = vmul.f32 %v2332_v39, %v2326_v24 }
 0x4ff   : > { %v1017_v36 = vpop.permute.xlu0 %1016 }
 0x500   : > { %1037 = vmatpush.msrb.mxu2 %v1017_v36 }
 0x501   : > { %2105 = vmatmul.msk.f32.vlgmr.msrb.gmra.mxu2 %vm913_vm5, %v1015_v37  ;;  %v2310_v37 = vld [vmem:[#allocation10] ss:$0 sm:$0xff] }
 0x50e   : > { %v1128_v41 = vpop.permute.xlu1 %1127 }
 0x50f   : > { %1216 = vrot.lane.b32.xlu2 %v3053_v51, %s2731_s3  ;;  %1148 = vmatpush.msra.mxu2 %v1128_v41 }
 0x510   : > { %2110 = vmatmul.msk.f32.vlgmr.msra.gmra.mxu2 %vm913_vm5, %v1126_v40 }
 0x511   : > { %1260 = vmatpush.msrb.mxu2 %v860_v50 }
 0x56a   : > { %v1213_v43 = vpop.xlane.xlu2 %1212 }
 0x56b   : > { %2333 = vrcp.f32 %v1213_v43 }
 0x571   : > { %v2334_v44 = vpop.eup %2333 }
 0x572   : > { %v1215_v45 = vmul.f32 %v2334_v44, %v2328_v31  ;;  %v1217_v46 = vpop.permute.xlu2 %1216 }
 0x573   : > { %1237 = vmatpush.msrb.mxu3 %v1217_v46 }
 0x574   : > { %2114 = vmatmul.msk.f32.vlgmr.msrb.gmra.mxu3 %vm913_vm5, %v1215_v45 }
 0x584   : > { %v1039_v48 = vpop.f32.mrf.mxu2 }
 0x585   : > { %2106 = vmatmul.msk.f32.vlgmr.msra.gmra.mxu0 %vm913_vm5, %v1039_v48 }
 0x586   : > { %1334 = vmatpush.msra.mxu0 %v1304_v10 }
 0x588   : > { %1335 = vmatpush.msra.mxu0 %v1303_v11 }
 0x58a   : > { %1336 = vmatpush.msra.mxu0 %v1302_v12 }
 0x58c   : > { %1337 = vmatpush.msra.mxu0 %v1301_v13 }
 0x593   : > { %v1150_v49 = vpop.f32.mrf.mxu2 }
 0x594   : > { %2111 = vmatmul.msk.f32.vlgmr.msrb.gmra.mxu0 %vm913_vm5, %v1150_v49 }
 0x5f7   : > { %v1239_v51 = vpop.f32.mrf.mxu3 }
 0x5f8   : > { %2115 = vmatmul.msk.f32.vlgmr.msrb.gmra.mxu2 %vm913_vm5, %v1239_v51 }
 0x602   : > { %v1062_v52 = vpop.f32.mrf.mxu0 }
 0x603   : > { %v1086_v54 = vadd.f32 %v3080_v15, %v1062_v52 }
 0x611   : > { %v1173_v53 = vpop.f32.mrf.mxu0 }
 0x612   : > { %v1176_v55 = vadd.f32 %v1173_v53, %v1086_v54 }
 0x67b   : > { %v1262_v57 = vpop.f32.mrf.mxu2 }
 0x67c   : > { %v1265_v58 = vadd.f32 %v1262_v57, %v1176_v55 }
 0x67e   : > { %v1269_v59 = vadd.f32 %v2309_v56, %v1265_v58 }
 0x680   : > { %v3103_v60 = vadd.f32 %v1269_v59, %v2991_v0  ;;  %v1305_v0 = vld [vmem:[#allocation7] sm:$0xff] }
 0x681   : > { %1366 = vmatpush.msra.mxu1 %v1305_v0 }
 0x682   : > { %v1271_v61 = vsel %vm808_vm0, %v3103_v60, 0.0  ;;  %2117 = vmatmul.msk.f32.vlgmr.msra.gmra.mxu1 %vm808_vm0, %v804_v7 }
 0x683   : > { %1272 = vadd.xlane.f32.xlu0 %v1271_v61 }
 0x68a   : > { %2118 = vmatmul.msk.f32.gmra.mxu1 %vm808_vm0, %v805_v9 }
 0x6f6   : > { %v1273_v2 = vpop.xlane.xlu0 %1272 }
 0x6f7   : > { %v1274_v3 = vmul.f32 %v1273_v2, %v2995_v8 }
 0x6f9   : > { %v1275_v4 = vsub.f32 %v3103_v60, %v1274_v3 }
 0x6fb   : > { %v1276_v5 = vmul.f32 %v1275_v4, %v1275_v4 }
 0x6fd   : > { %v1277_v6 = vsel %vm808_vm0, %v1276_v5, 0.0 }
 0x6fe   : > { %1278 = vadd.xlane.f32.xlu2 %v1277_v6 }
 0x6ff   : > { %v1368_v36 = vpop.f32.mrf.mxu1 }
 0x700   : > { %v1369_v38 = vadd.f32 %v2310_v37, %v1368_v36 }
 0x707   : > { %v1371_v39 = vpop.f32.mrf.mxu1 }
 0x708   : > { %v1372_v40 = vadd.f32 %v2310_v37, %v1371_v39 }
 0x70a   : > { %v3122_v41 = vpack.i.bf16 %v1369_v38, %v1372_v40  ;;  %2119 = vmatpush.xpose.msk.msra.mxu3 %vm913_vm5, %v1372_v40 }
 0x70e   : > { %2120 = vmatpush.xpose.msk.msra.mxu3 %vm913_vm5, %v1369_v38 }
 0x716   : > { %2288 = vrot.lane.b32.xlu2 %v3122_v41, %s2726_s12 }
 0x71e   : > { %1566 = vrot.lane.b32.xlu2 %v1372_v40, %s2728_s24 }
 0x726   : > { %1662 = vrot.lane.b32.xlu2 %v1372_v40, %s2727_s26 }
 0x771   : > { %v1279_v14 = vpop.xlane.xlu2 %1278 }
 0x772   : > { %v1280_v15 = vmul.f32 %v1279_v14, %v2995_v8 }
 0x774   : > { %v1281_v16 = vadd.f32 1e-05, %v1280_v15 }
 0x776   : > { %2335 = vrsqrt.f32 %v1281_v16  ;;  %vm1288_vm7 = vweird.f32 %v1281_v16 }
 0x779   : > { %v2289_v45 = vpop.permute.xlu2 %2288 }
 0x77a   : > { %v2291_v46 = vunpack.i.h.bf16 %v2289_v45  ;;  %v2290_v47 = vunpack.i.l.bf16 %v2289_v45  ;;  %v1310_v45 = vld [vmem:[#allocation8 + $0x8] sm:$0xff] }
 0x77c   : > { %v2336_v17 = vpop.eup %2335  ;;  %1438 = vmatpush.msra.mxu2 %v2290_v47 }
 0x77d   : > { %v1283_v18 = vmul.f32 %v2336_v17, %v1281_v16  ;;  %vm1289_vm6 = vweird.f32 %v2336_v17 }
 0x77e   : > { %vm1290_vm8 = vmor %vm1288_vm7, %vm1289_vm6  ;;  %1439 = vmatpush.msra.mxu2 %v2291_v46  ;;  %v1311_v46 = vld [vmem:[#allocation8 + $0x10] sm:$0xff] }
 0x77f   : > { %v1284_v19 = vmul.f32 %v2336_v17, %v1283_v18 }
 0x780   : > { %1534 = vmatpush.msrb.mxu2 %v1310_v45  ;;  %v1846_v45 = vld [vmem:[%s3260_s18] sm:$0xff] }
 0x781   : > { %v1285_v20 = vmul.f32 0.5, %v1284_v19  ;;  %v1567_v48 = vpop.permute.xlu2 %1566 }
 0x782   : > { %2129 = vmatpush.xpose.msk.msrb.mxu1 %vm913_vm5, %v1567_v48 }
 0x783   : > { %v1286_v21 = vsub.f32 1.5, %v1285_v20 }
 0x785   : > { %v1287_v22 = vmul.f32 %v2336_v17, %v1286_v21 }
 0x787   : > { %v1291_v24 = vsel %vm1290_vm8, %v2336_v17, %v1287_v22 }
 0x788   : > { %v1292_v27 = vmul.f32 %v1291_v24, %v1275_v4 }
 0x789   : > { %v1663_v2 = vpop.permute.xlu2 %1662 }
 0x78a   : > { %v1294_v29 = vmul.f32 %v1293_v23, %v1292_v27 }
 0x78c   : > { %v1296_v31 = vadd.f32 %v1295_v26, %v1294_v29 }
 0x78e   : > { %v1298_v32 = vmul.f32 %v1297_v28, %v1296_v31 }
 0x790   : > { %v1300_v34 = vadd.f32 %v1299_v30, %v1298_v32 }
 0x792   : > { %2116 = vmatmul.msk.f32.vlgmr.msra.gmra.mxu0 %vm808_vm0, %v1300_v34 }
 0x80f   : > { %v1339_v43 = vpop.f32.mrf.mxu0 }
 0x810   : > { %v1340_v44 = vadd.f32 %v2311_v42, %v1339_v43 }
 0x812   : > { %2121 = vmatmul.msk.f32.vlgmr.msra.gmra.mxu3 %vm913_vm5, %v1340_v44 }
 0x895   : > { %v1400_v49 = vpop.f32.mrf.mxu3 }
 0x896   : > { %v1404_v50 = vsel %vm1403_vm9, %v1400_v49, -inf }
 0x897   : > { %1405 = vmax.xlane.f32.xlu1 %v1404_v50 }
 0x8b0   : > { %1446 = vrot.lane.b32.xlu1 %v1369_v38, %s2725_s0 }
 0x8b8   : > { %1564 = vrot.lane.b32.xlu1 %v1369_v38, %s2728_s24 }
 0x8c0   : > { %1660 = vrot.lane.b32.xlu1 %v1369_v38, %s2727_s26 }
 0x90a   : > { %v1406_v51 = vpop.xlane.xlu1 %1405 }
 0x90b   : > { %v1407_v52 = vsub.f32 %v1400_v49, %v1406_v51 }
 0x90d   : > { %v1408_v53 = vmul.f32 1.442695, %v1407_v52 }
 0x90f   : > { %2337 = vpow2.f32 %v1408_v53 }
 0x915   : > { %v2338_v54 = vpop.eup %2337 }
 0x916   : > { %v1410_v55 = vsel %vm1403_vm9, %v2338_v54, 0.0 }
 0x917   : > { %1411 = vadd.xlane.f32.xlu0 %v1410_v55 }
 0x922   : > { %v1447_v56 = vpop.permute.xlu1 %1446 }
 0x92a   : > { %v1565_v57 = vpop.permute.xlu1 %1564 }
 0x92b   : > { %1448 = vrot.lane.b32.xlu0 %v1372_v40, %s2725_s0  ;;  %2130 = vmatpush.xpose.msk.msrb.mxu1 %vm913_vm5, %v1565_v57 }
 0x932   : > { %v1661_v3 = vpop.permute.xlu1 %1660 }
 0x933   : > { %1444 = vrot.lane.b32.xlu0 %v1340_v44, %s2725_s0  ;;  %s787_s0 = sand.u32 1, %s2703_s22  }
 0x934   : > { %s2093_s12 = sshll.u32 %s787_s0, 3  ;;  %s1885_s30 = scalar_lea.sflag [#allocation4], %s787_s0 }
 0x935   : > { %s789_s10 = scalar_lea.vmem [#allocation17], %s2093_s12 }
 0x936   : > { %s1897_s25 = sshll.u32 %s789_s10, 4  ;;  %s1898_s25 = int_to_ptr.vmem [resolvable:$true] %s1897_s25 }
 0x93b   : > { %1562 = vrot.lane.b32.xlu0 %v1340_v44, %s2728_s24 }
 0x943   : > { %1658 = vrot.lane.b32.xlu0 %v1340_v44, %s2727_s26  ;;  %s2142_s26 = sshll.u32 %s2859_s2, 3 }
 0x98a   : > { %v1412_v58 = vpop.xlane.xlu0 %1411 }
 0x98b   : > { %2339 = vrcp.f32 %v1412_v58 }
 0x991   : > { %v2340_v59 = vpop.eup %2339 }
 0x992   : > { %v1414_v61 = vmul.f32 %v2340_v59, %v2338_v54 }
 0x994   : > { %2122 = vmatmul.msk.f32.vlgmr.msra.gmra.mxu2 %vm1403_vm9, %v1414_v61  ;;  %v2312_v61 = vld [vmem:[#allocation11] ss:$0 sm:$0xff] }
 0x995   : > { %1652 = vmatpush.msra.mxu2 %v1311_v46 }
 0x99d   : > { %v1449_v62 = vpop.permute.xlu0 %1448 }
 0x99e   : > { %2123 = vmatpush.xpose.msk.msrb.mxu0 %vm913_vm5, %v1449_v62 }
 0x9a2   : > { %2124 = vmatpush.xpose.msk.msrb.mxu0 %vm913_vm5, %v1447_v56 }
 0x9a5   : > { %v1445_v1 = vpop.permute.xlu0 %1444 }
 0x9a6   : > { %1557 = vmatpush.msra.mxu0 %v1309_v63 }
 0x9a7   : > { %2125 = vmatmul.msk.f32.vlgmr.msrb.gmra.mxu0 %vm913_vm5, %v1445_v1 }
 0x9a8   : > { %2134 = vmatpush.xpose.msk.msrb.mxu0 %vm913_vm5, %v1663_v2 }
 0x9ac   : > { %2135 = vmatpush.xpose.msk.msrb.mxu0 %vm913_vm5, %v1661_v3 }
 0x9ad   : > { %v1563_v4 = vpop.permute.xlu0 %1562 }
 0x9ae   : > { %2131 = vmatmul.msk.f32.vlgmr.msrb.gmra.mxu1 %vm913_vm5, %v1563_v4 }
 0x9b5   : > { %v1659_v6 = vpop.permute.xlu0 %1658 }
 0xa17   : > { %v1441_v5 = vpop.f32.mrf.mxu2 }
 0xa18   : > { %2128 = vmatmul.msk.f32.vlgmr.msra.gmra.mxu0 %vm913_vm5, %v1441_v5 }
 0xa20   : > { %2136 = vmatmul.msk.f32.vlgmr.msrb.gmra.mxu0 %vm913_vm5, %v1659_v6 }
 0xa24   : > { %v1473_v0 = vpop.f32.mrf.mxu0 }
 0xa25   : > { %v1476_v7 = vsel %vm1403_vm9, %v1473_v0, -inf }
 0xa26   : > { %1477 = vmax.xlane.f32.xlu2 %v1476_v7 }
 0xa2b   : > { %v1591_v9 = vpop.f32.mrf.mxu1 }
 0xa2c   : > { %v1594_v10 = vsel %vm1403_vm9, %v1591_v9, -inf }
 0xa2d   : > { %1595 = vmax.xlane.f32.xlu1 %v1594_v10  ;;  %v1791_v10 = vld [vmem:[#allocation13 + $0x10] sm:$0xff] }
 0xa46   : > { %2293 = vrot.lane.b32.xlu1 %v3122_v41, %s2729_s28 }
 0xa95   : > { %v3158_v11 = vpop.f32.mrf.mxu0 }
 0xa99   : > { %v1478_v12 = vpop.xlane.xlu2 %1477 }
 0xa9a   : > { %v1479_v13 = vsub.f32 %v1473_v0, %v1478_v12  ;;  %v1789_v12 = vld [vmem:[#allocation13] sm:$0xff] }
 0xa9c   : > { %v1480_v14 = vmul.f32 1.442695, %v1479_v13 }
 0xa9d   : > { %v1687_v15 = vpop.f32.mrf.mxu0 }
 0xa9e   : > { %2341 = vpow2.f32 %v1480_v14  ;;  %v1690_v16 = vsel %vm1403_vm9, %v1687_v15, -inf }
 0xa9f   : > { %1691 = vmax.xlane.f32.xlu0 %v1690_v16 }
 0xaa0   : > { %v1596_v17 = vpop.xlane.xlu1 %1595 }
 0xaa1   : > { %v1597_v18 = vsub.f32 %v1591_v9, %v1596_v17  ;;  %v1792_v9 = vld [vmem:[#allocation13 + $0x18] sm:$0xff] }
 0xaa3   : > { %v1598_v20 = vmul.f32 1.442695, %v1597_v18 }
 0xaa4   : > { %v2342_v19 = vpop.eup %2341 }
 0xaa5   : > { %v1482_v21 = vsel %vm1403_vm9, %v2342_v19, 0.0  ;;  %2343 = vpow2.f32 %v1598_v20 }
 0xaa6   : > { %1483 = vadd.xlane.f32.xlu2 %v1482_v21  ;;  %v1781_v21 = vperm.slane %v3036_v33, 4 }
 0xaab   : > { %v2344_v22 = vpop.eup %2343 }
 0xaac   : > { %v1600_v23 = vsel %vm1403_vm9, %v2344_v22, 0.0 }
 0xaad   : > { %1601 = vadd.xlane.f32.xlu0 %v1600_v23  ;;  %v1783_v23 = vperm.slane %v3036_v33, 5  ;;  %v1852_v33 = vld [vmem:[%s3260_s18 + $0x30] sm:$0xff] }
 0xab8   : > { %v2294_v24 = vpop.permute.xlu1 %2293 }
 0xab9   : > { %v2295_v26 = vunpack.i.l.bf16 %v2294_v24  ;;  %v2296_v27 = vunpack.i.h.bf16 %v2294_v24 }
 0xabb   : > { %1510 = vmatpush.msrb.mxu3 %v2295_v26 }
 0xabd   : > { %1511 = vmatpush.msrb.mxu3 %v2296_v27  ;;  %v1787_v27 = vperm.slane %v3030_v25, 5  ;;  %v1851_v25 = vld [vmem:[%s3260_s18 + $0x28] sm:$0xff] }
 0xabe   : > { %2298 = vrot.lane.b32.xlu2 %v3122_v41, %s2730_s20  ;;  %s3301_s20 = sld [smem:[#allocation39_spill]] }
 0xac4   : > { %s1895_s1 = scalar_lea.hbm %s3301_s20, %s2142_s26  ;;  %s2649_s4 = scalar_lea.hbm %s3301_s20, 16 }
 0xac5   : > { %s1899_s27 = sshll.u32 %s1895_s1, 4  ;;  %s1900_s27 = int_to_ptr.hbm [resolvable:$true] %s1899_s27 }
 0xac6   : > { %s2643_s29 = sshra.s32 %s1900_s27, 4  ;;  %s2644_s29 = int_to_ptr.hbm [resolvable:$true] %s2643_s29 }
 0xac7   : > { %s2645_s2 = scalar_lea.hbm %s2644_s29, 8  ;;  %p2650_p3 = scmp.lt.s32.totalorder %s2644_s29, %s3301_s20 }
 0xac8   : > { %p2646_p0 = scmp.ne.s32.totalorder %s2644_s29, %s2645_s2  ;;  %p2651_p4 = scmp.lt.s32.totalorder %s2649_s4, %s2645_s2 }
 0xaca   : > { %p2647_p1 = pnand %p2646_p0, %p2876_p5  ;;  %p2652_p7 = por %p2651_p4, %p2650_p3 }
 0xacc   : > { %p2648_p2 = pneg %p2647_p1 }
 0xace   : > { %p2653_p8 = pnand %p2652_p7, %p2648_p2 }
 0xb12   : > { %v1692_v28 = vpop.xlane.xlu0 %1691 }
 0xb13   : > { %v1693_v29 = vsub.f32 %v1687_v15, %v1692_v28 }
 0xb15   : > { %v1694_v30 = vmul.f32 1.442695, %v1693_v29 }
 0xb17   : > { %2345 = vpow2.f32 %v1694_v30 }
 0xb19   : > { %v1484_v31 = vpop.xlane.xlu2 %1483 }
 0xb1a   : > { %2347 = vrcp.f32 %v1484_v31  ;;  %v2313_v31 = vld [vmem:[#allocation14] ss:$0 sm:$0xff] }
 0xb1d   : > { %v2346_v32 = vpop.eup %2345 }
 0xb1e   : > { %v1696_v34 = vsel %vm1403_vm9, %v2346_v32, 0.0 }
 0xb1f   : > { %1697 = vadd.xlane.f32.xlu0 %v1696_v34 }
 0xb20   : > { %v2348_v36 = vpop.eup %2347  ;;  %v1602_v39 = vpop.xlane.xlu0 %1601 }
 0xb21   : > { %v1486_v37 = vmul.f32 %v2348_v36, %v2342_v19  ;;  %v2299_v38 = vpop.permute.xlu2 %2298  ;;  %2349 = vrcp.f32 %v1602_v39 }
 0xb22   : > { %v2300_v40 = vunpack.i.l.bf16 %v2299_v38  ;;  %v2301_v42 = vunpack.i.h.bf16 %v2299_v38  ;;  %v1850_v38 = vld [vmem:[%s3260_s18 + $0x20] sm:$0xff] }
 0xb23   : > { %2126 = vmatmul.msk.f32.vlgmr.msrb.gmra.mxu3 %vm1403_vm9, %v1486_v37 }
 0xb24   : > { %1628 = vmatpush.msra.mxu3 %v2300_v40  ;;  %v1849_v40 = vld [vmem:[%s3260_s18 + $0x18] sm:$0xff] }
 0xb26   : > { %1629 = vmatpush.msra.mxu3 %v2301_v42 }
 0xb27   : > { %v2350_v43 = vpop.eup %2349 }
 0xb28   : > { %v1604_v44 = vmul.f32 %v2350_v43, %v2344_v22  ;;  %v1848_v43 = vld [vmem:[%s3260_s18 + $0x10] sm:$0xff] }
 0xb2b   : > { %2132 = vmatmul.msk.f32.vlgmr.msra.gmra.mxu3 %vm1403_vm9, %v1604_v44  ;;  %v1847_v44 = vld [vmem:[%s3260_s18 + $0x8] sm:$0xff] }
 0xb33   : > { %2303 = vrot.lane.b32.xlu0 %v3122_v41, %s2731_s3  ;;  %v1312_v41 = vld [vmem:[#allocation8 + $0x18] sm:$0xff] }
 0xb34   : > { %1748 = vmatpush.msrb.mxu3 %v1312_v41 }
 0xb92   : > { %v1698_v47 = vpop.xlane.xlu0 %1697 }
 0xb93   : > { %2351 = vrcp.f32 %v1698_v47 }
 0xb99   : > { %v2352_v50 = vpop.eup %2351 }
 0xb9a   : > { %v1700_v53 = vmul.f32 %v2352_v50, %v2346_v32  ;;  %v1853_v32 = vld [vmem:[%s3260_s18 + $0x38] sm:$0xff] }
 0xb9b   : > { %1870 = vmatpush.msra.mxu0 %v1853_v32 }
 0xb9d   : > { %1871 = vmatpush.msra.mxu0 %v1852_v33 }
 0xb9f   : > { %1872 = vmatpush.msra.mxu0 %v1851_v25 }
 0xba1   : > { %1873 = vmatpush.msra.mxu0 %v1850_v38 }
 0xba3   : > { %1874 = vmatpush.msra.mxu0 %v1849_v40 }
 0xba5   : > { %v2304_v49 = vpop.permute.xlu0 %2303  ;;  %1875 = vmatpush.msra.mxu0 %v1848_v43 }
 0xba6   : > { %v1513_v48 = vpop.f32.mrf.mxu3  ;;  %v2305_v51 = vunpack.i.l.bf16 %v2304_v49  ;;  %v2306_v52 = vunpack.i.h.bf16 %v2304_v49 }
 0xba7   : > { %2127 = vmatmul.msk.f32.vlgmr.msrb.gmra.mxu2 %vm913_vm5, %v1513_v48  ;;  %1876 = vmatpush.msra.mxu0 %v1847_v44 }
 0xba8   : > { %1724 = vmatpush.msra.mxu1 %v2305_v51  ;;  %1812 = vmatpush.msrb.mxu2 %v1792_v9 }
 0xba9   : > { %1877 = vmatpush.msra.mxu0 %v1846_v45 }
 0xbaa   : > { %1725 = vmatpush.msra.mxu1 %v2306_v52  ;;  %1813 = vmatpush.msrb.mxu2 %v1791_v10 }
 0xbab   : > { %2137 = vmatmul.msk.f32.vlgmr.msra.gmra.mxu1 %vm1403_vm9, %v1700_v53 }
 0xbae   : > { %v1631_v54 = vpop.f32.mrf.mxu3 }
 0xbaf   : > { %2133 = vmatmul.msk.f32.vlgmr.msra.gmra.mxu2 %vm913_vm5, %v1631_v54 }
 0xc28   : > { %v1727_v55 = vpop.f32.mrf.mxu1 }
 0xc29   : > { %2138 = vmatmul.msk.f32.vlgmr.msrb.gmra.mxu3 %vm913_vm5, %v1727_v55 }
 0xc2a   : > { %v1536_v56 = vpop.f32.mrf.mxu2 }
 0xc2b   : > { %v1560_v58 = vadd.f32 %v3158_v11, %v1536_v56  ;;  %v1790_v11 = vld [vmem:[#allocation13 + $0x8] sm:$0xff] }
 0xc2c   : > { %1814 = vmatpush.msrb.mxu2 %v1790_v11 }
 0xc2e   : > { %1815 = vmatpush.msrb.mxu2 %v1789_v12 }
 0xc32   : > { %v1654_v57 = vpop.f32.mrf.mxu2 }
 0xc33   : > { %v1657_v59 = vadd.f32 %v1654_v57, %v1560_v58 }
 0xcac   : > { %v1750_v62 = vpop.f32.mrf.mxu3 }
 0xcad   : > { %v1753_v63 = vadd.f32 %v1750_v62, %v1657_v59  ;;  %v2732_v62 = vmov -1.0  }
 0xcaf   : > { %v1757_v1 = vadd.f32 %v2312_v61, %v1753_v63 }
 0xcb1   : > { %v1758_v2 = vadd.f32 %v1757_v1, %v3103_v60 }
 0xcb3   : > { %v1759_v3 = vsel %vm808_vm0, %v1758_v2, 0.0 }
 0xcb4   : > { %1760 = vadd.xlane.f32.xlu1 %v1759_v3 }
 0xd27   : > { %v1761_v4 = vpop.xlane.xlu1 %1760 }
 0xd28   : > { %v1762_v5 = vmul.f32 %v1761_v4, %v2995_v8 }
 0xd2a   : > { %v1763_v6 = vsub.f32 %v1758_v2, %v1762_v5  ;;  %v2314_v5 = vld [vmem:[#allocation16] ss:$0 sm:$0xff] }
 0xd2c   : > { %v1764_v0 = vmul.f32 %v1763_v6, %v1763_v6 }
 0xd2e   : > { %v1765_v7 = vsel %vm808_vm0, %v1764_v0, 0.0 }
 0xd2f   : > { %1766 = vadd.xlane.f32.xlu2 %v1765_v7 }
 0xda2   : > { %v1767_v13 = vpop.xlane.xlu2 %1766 }
 0xda3   : > { %v1768_v60 = vmul.f32 %v1767_v13, %v2995_v8  ;;  %v1785_v8 = vperm.slane %v3038_v35, 4 }
 0xda5   : > { %v1769_v14 = vadd.f32 1e-05, %v1768_v60 }
 0xda7   : > { %2353 = vrsqrt.f32 %v1769_v14  ;;  %vm1776_vm11 = vweird.f32 %v1769_v14 }
 0xdad   : > { %v2354_v15 = vpop.eup %2353 }
 0xdae   : > { %v1771_v16 = vmul.f32 %v2354_v15, %v1769_v14  ;;  %vm1777_vm10 = vweird.f32 %v2354_v15 }
 0xdaf   : > { %vm1778_vm12 = vmor %vm1776_vm11, %vm1777_vm10 }
 0xdb0   : > { %v1772_v17 = vmul.f32 %v2354_v15, %v1771_v16 }
 0xdb2   : > { %v1773_v18 = vmul.f32 0.5, %v1772_v17 }
 0xdb4   : > { %v1774_v19 = vsub.f32 1.5, %v1773_v18 }
 0xdb6   : > { %v1775_v20 = vmul.f32 %v2354_v15, %v1774_v19 }
 0xdb8   : > { %v1779_v22 = vsel %vm1778_vm12, %v2354_v15, %v1775_v20 }
 0xdb9   : > { %v1780_v24 = vmul.f32 %v1779_v22, %v1763_v6 }
 0xdbb   : > { %v1782_v26 = vmul.f32 %v1781_v21, %v1780_v24 }
 0xdbd   : > { %v1784_v28 = vadd.f32 %v1783_v23, %v1782_v26 }
 0xdbf   : > { %v1786_v29 = vmul.f32 %v1785_v8, %v1784_v28 }
 0xdc1   : > { %v1788_v30 = vadd.f32 %v1787_v27, %v1786_v29 }
 0xdc3   : > { %2139 = vmatmul.msk.f32.vlgmr.msrb.gmra.mxu2 %vm808_vm0, %v1788_v30 }
 0xe46   : > { %v1817_v34 = vpop.f32.mrf.mxu2 }
 0xe47   : > { %v1818_v36 = vadd.f32 %v2313_v31, %v1817_v34 }
 0xe49   : > { %v1821_v35 = vmul.f32 0.70710677, %v1818_v36  ;;  %v1820_v2 = vmul.f32 0.5, %v1818_v36 }
 0xe4b   : > { %v1824_v37 = vand.u32 2147483647, %v1821_v35  ;;  %vm1822_vm13 = vcmp.ge.f32.partialorder %v1821_v35, 0.0 }
 0xe4c   : > { %v1823_v63 = vsel %vm1822_vm13, 1.0, %v2732_v62 }
 0xe4d   : > { %v1825_v39 = vmul.f32 0.3275911, %v1824_v37  ;;  %v1837_v47 = vsub.f32 0.0, %v1824_v37 }
 0xe4f   : > { %v1826_v42 = vadd.f32 1.0, %v1825_v39  ;;  %v1838_v50 = vmul.f32 %v1837_v47, %v1824_v37 }
 0xe51   : > { %2355 = vrcp.f32 %v1826_v42  ;;  %v1839_v53 = vmul.f32 1.442695, %v1838_v50 }
 0xe53   : > { %2357 = vpow2.f32 %v1839_v53 }
 0xe57   : > { %v2356_v46 = vpop.eup %2355 }
 0xe58   : > { %v1828_v48 = vmul.f32 1.0614054, %v2356_v46 }
 0xe59   : > { %v2358_v58 = vpop.eup %2357 }
 0xe5a   : > { %v1829_v49 = vadd.f32 -1.4531521, %v1828_v48 }
 0xe5c   : > { %v1830_v51 = vmul.f32 %v2356_v46, %v1829_v49 }
 0xe5e   : > { %v1831_v52 = vadd.f32 1.4214138, %v1830_v51 }
 0xe60   : > { %v1832_v54 = vmul.f32 %v2356_v46, %v1831_v52 }
 0xe62   : > { %v1833_v41 = vadd.f32 -0.28449672, %v1832_v54 }
 0xe64   : > { %v1834_v55 = vmul.f32 %v2356_v46, %v1833_v41 }
 0xe66   : > { %v1835_v56 = vadd.f32 0.2548296, %v1834_v55 }
 0xe68   : > { %v1836_v57 = vmul.f32 %v2356_v46, %v1835_v56 }
 0xe6a   : > { %v1841_v59 = vmul.f32 %v2358_v58, %v1836_v57 }
 0xe6c   : > { %v1842_v61 = vsub.f32 1.0, %v1841_v59 }
 0xe6e   : > { %v1843_v1 = vmul.f32 %v1842_v61, %v1823_v63 }
 0xe70   : > { %v1844_v3 = vadd.f32 1.0, %v1843_v1 }
 0xe72   : > { %v1845_v4 = vmul.f32 %v1844_v3, %v1820_v2 }
 0xe74   : > { %2140 = vmatmul.msk.f32.vlgmr.msra.gmra.mxu0 %vm1858_vm14, %v1845_v4 }
 0xef1   : > { %v1879_v6 = vpop.f32.mrf.mxu0 }
 0xef2   : > { %v1880_v0 = vadd.f32 %v2314_v5, %v1879_v6 }
 0xef4   : > { %v1882_v7 = vadd.f32 %v1880_v0, %v1788_v30 }
 0xef6   : > { %1883 = vst.msk [vmem:[%s789_s10] sm:$0xff] %vm808_vm0, %v1882_v7 }
 0xef7   : > { %2656 = shalt.err (!%p2653_p8)
}
 0xef8   : > { %2182 = dma.vmem_to_hbm [thread:$0]  (%p2876_p5), %s1898_s25, 128, %s1900_s27, %s1885_s30  }
 0xef9 PF: > { %s3303_s0 = sld [smem:[#allocation26_spill]] }
 0xefa   : > { %s3304_s24 = sld [smem:[#allocation24_spill]] }
 0xeff   : > { %p2234_p9 = scmp.ge.s32.totalorder %s3303_s0, 2 }
 0xf00   : > { %s1911_s1 = sand.u32 1, %s3304_s24  }
 0xf01   : > { %p2213_p10 = pnand %p2234_p9, %p2880_p6  ;;  %s1912_s10 = scalar_lea.sflag [#allocation4], %s1911_s1 }
 0xf03   : > { %p2214_p11 = pneg %p2213_p10 }
 0xf05   : > { %2694 = dma.done.wait (%p2214_p11), %s1912_s10, 128  }
 0xf06   : > { %2696 = vsyncadd (%p2214_p11), %s1912_s10, 4294967168  ;;  %s3306_s24 = sld [smem:[#allocation27_spill]]  ;;  %s3309_s1 = smov %s2703_s22 }
 0xf07   : > { %s3307_s29 = sld [smem:[#allocation25_spill]] }
 0xf08   : > { %s3308_s23 = sld [smem:[#allocation28_spill]] }
 0xf0c   : > { %p35_p12 = scmp.ge.s32.totalorder %s3306_s24, 4  }
 0xf0d   : > { %s3310_s22 = smov %s3307_s29 }
 0xf0e   :  { %37 = sbr.rel (!%p35_p12) target bundleno = 18 (0x12), region = 178 }
 0xf13   :  { %1918 = vsyncpa [#allocation3], 1 }
 0xf14   :  { %1920 = vsyncpa [#allocation3 + $0x1], 1 }
 0xf15   :  { %1921 = vsyncpa [#allocation6], 1 }
 0xf16   :  { %1922 = vsyncpa [#allocation9], 1 }
 0xf17   :  { %1923 = vsyncpa [#allocation12], 1 }
 0xf18   :  { %1924 = vsyncpa [#allocation15], 1 }
 0xf19   :  { %1925 = vsyncpa [#allocation4], 1 }
 0xf1a   :  { %1927 = vsyncpa [#allocation4 + $0x1], 1 }

</bundles_post_ra>
